<compile_context>
chip_gen: v5e
topology: v5e:2x2
jax: 0.10.0
libtpu: 0.0.40
codegen_flags: <defaults>
</compile_context>

<pallas_src>
import math
from functools import partial

import jax
import jax.numpy as jnp
from jax import lax
from jax.experimental import pallas as pl
from jax.experimental.pallas import tpu as pltpu


# ----------------------------- Pallas kernel -----------------------------

def dtsp_kernel(num_mp, dim,
                ev_ref, evt_ref, wc_ref, segt_ref, invcnt_ref, degv_ref, vinit_ref,
                iw0_ref, ib0_ref, iw1_ref, ib1_ref, iw2_ref, ib2_ref, iw3_ref, ib3_ref,
                emw_ref, emb_ref, vmw_ref, vmb_ref,
                vo_w01_ref, vo_b01_ref, vo_w2_ref, vo_b2_ref,
                lv_w_ref, lv_b_ref, le_w_ref, le_b_ref,
                out_ref):
    EV = ev_ref[...]            # (M, N)  0/1 incidence
    EVT = evt_ref[...]          # (N, M)  pre-transposed in the wrapper (no XLU vxpose)
    WC = wc_ref[...]            # (M, 8)  2 real features, zero padded
    deg_v = degv_ref[...]       # (N, 1)  column sums of EV

    # ---- init_mlp: 2 -> d/8 -> d/4 -> d/2 -> d (runs once; tiny, left as-is) ----
    h = jnp.maximum(jnp.dot(WC, iw0_ref[...], preferred_element_type=jnp.float32) + ib0_ref[...], 0.0)
    h = jnp.maximum(jnp.dot(h, iw1_ref[...], preferred_element_type=jnp.float32) + ib1_ref[...], 0.0)
    h = jnp.maximum(jnp.dot(h, iw2_ref[...], preferred_element_type=jnp.float32) + ib2_ref[...], 0.0)
    E = jnp.dot(h, iw3_ref[...], preferred_element_type=jnp.float32) + ib3_ref[...]   # (M, dim)

    n_vertices = EVT.shape[0]
    V = jnp.broadcast_to(vinit_ref[...], (n_vertices, dim))   # v_init/sqrt(dim), repeated
    cE = jnp.zeros_like(E)
    cV = jnp.zeros_like(V)

    emw, emb = emw_ref[...], emb_ref[...]
    vmw, vmb = vmw_ref[...], vmb_ref[...]
    lv_w, lv_b = lv_w_ref[...], lv_b_ref[...]     # (2*dim, 4*dim), (1, 4*dim)
    le_w, le_b = le_w_ref[...], le_b_ref[...]

    def lstm_cell(x, hst, cst, w_cat, b_cat):
        # Fused gates: one (rows, 2*dim) @ (2*dim, 4*dim) matmul, PyTorch order i,f,g,o.
        xh = jnp.concatenate([x, hst], axis=-1)
        gates = jnp.dot(xh, w_cat, preferred_element_type=jnp.float32) + b_cat
        i = jax.nn.sigmoid(gates[:, 0 * dim:1 * dim])
        f = jax.nn.sigmoid(gates[:, 1 * dim:2 * dim])
        g = jnp.tanh(gates[:, 2 * dim:3 * dim])
        o = jax.nn.sigmoid(gates[:, 3 * dim:4 * dim])
        c_new = f * cst + i * g
        return o * jnp.tanh(c_new), c_new

    def one_round(carry):
        E, V, cE, cV = carry
        # edge-message MLP; the last (no-ReLU) layer is algebraically moved AFTER the
        # EV^T aggregation so it runs on N rows instead of M rows:
        #   EV^T @ (h2 @ W2 + b2) == (EV^T @ h2) @ W2 + deg_v * b2
        h1 = jnp.maximum(jnp.dot(E, emw[0], preferred_element_type=jnp.float32) + emb[0], 0.0)
        h2 = jnp.maximum(jnp.dot(h1, emw[1], preferred_element_type=jnp.float32) + emb[1], 0.0)
        agg = jnp.dot(EVT, h2, preferred_element_type=jnp.float32)                     # (N, dim)
        xv = jnp.dot(agg, emw[2], preferred_element_type=jnp.float32) + deg_v * emb[2]
        V, cV = lstm_cell(xv, V, cV, lv_w, lv_b)

        # vertex-message MLP (N rows — already cheap)
        g1 = jnp.maximum(jnp.dot(V, vmw[0], preferred_element_type=jnp.float32) + vmb[0], 0.0)
        g2 = jnp.maximum(jnp.dot(g1, vmw[1], preferred_element_type=jnp.float32) + vmb[1], 0.0)
        msg_v = jnp.dot(g2, vmw[2], preferred_element_type=jnp.float32) + vmb[2]
        xe = jnp.dot(EV, msg_v, preferred_element_type=jnp.float32)                    # (M, dim)
        E, cE = lstm_cell(xe, E, cE, le_w, le_b)
        return E, V, cE, cV

    # message-passing loop, manually unrolled by 2 for cross-iteration scheduling
    carry = (E, V, cE, cV)
    n_pairs, rem = num_mp // 2, num_mp % 2
    if n_pairs > 0:
        carry = lax.fori_loop(0, n_pairs, lambda _, c: one_round(one_round(c)), carry)
    if rem:
        carry = one_round(carry)
    E, V, cE, cV = carry

    # edge_vote_mlp: dim -> dim -> dim -> 1, with the final (.,dim)@(dim,1) matmul and
    # the per-graph mean folded together (no lane-1 (M,1) intermediate):
    #   mean_g(h @ w2 + b2) == ((seg^T @ h) @ w2) * (1/n_edges) + b2
    y = jnp.maximum(jnp.dot(E, vo_w01_ref[0], preferred_element_type=jnp.float32) + vo_b01_ref[0], 0.0)
    y = jnp.maximum(jnp.dot(y, vo_w01_ref[1], preferred_element_type=jnp.float32) + vo_b01_ref[1], 0.0)
    gsum = jnp.dot(segt_ref[...], y, preferred_element_type=jnp.float32)               # (G, dim)
    out_ref[...] = (jnp.dot(gsum, vo_w2_ref[...], preferred_element_type=jnp.float32)
                    * invcnt_ref[...] + vo_b2_ref[...])


# ----------------------------- wrapper -----------------------------

def dtsp_forward(params, EV, W, C, seg_onehot, n_edges, num_mp):
    M, N = EV.shape
    G = seg_onehot.shape[1]
    dim = params['v_init'].shape[1]

    WC = jnp.concatenate([W, C], axis=1)                 # (M, 2)
    WC_pad = jnp.pad(WC, ((0, 0), (0, 6)))               # pad 2 -> 8 feature lanes
    iw0_pad = jnp.pad(params['iw0'], ((0, 6), (0, 0)))   # matching zero rows (no-op math)
    inv_cnt = (1.0 / jnp.maximum(n_edges.astype(jnp.float32), 1.0)).reshape(G, 1)
    v_scaled = params['v_init'] / jnp.sqrt(jnp.float32(dim))
    EVT = EV.T                                           # transposed once in HBM by XLA
    segT = seg_onehot.T                                  # (G, M)
    deg_v = jnp.sum(EV, axis=0).reshape(N, 1)            # vertex degrees (column sums)

    def pack_lstm(wih, whh, b):
        # (4,dim,dim)x2 + (4,1,dim) -> one (2*dim, 4*dim) weight and a (1, 4*dim) bias,
        # gate order i,f,g,o preserved along the output (lane) axis.
        w_x = jnp.concatenate(list(wih), axis=1)         # (dim, 4*dim)
        w_h = jnp.concatenate(list(whh), axis=1)         # (dim, 4*dim)
        return jnp.concatenate([w_x, w_h], axis=0), jnp.concatenate(list(b), axis=1)

    lv_w, lv_b = pack_lstm(params['lv_wih'], params['lv_whh'], params['lv_b'])
    le_w, le_b = pack_lstm(params['le_wih'], params['le_whh'], params['le_b'])

    inputs = (EV, EVT, WC_pad, segT, inv_cnt, deg_v, v_scaled,
              iw0_pad, params['ib0'], params['iw1'], params['ib1'],
              params['iw2'], params['ib2'], params['iw3'], params['ib3'],
              params['emw'], params['emb'], params['vmw'], params['vmb'],
              params['vo_w01'], params['vo_b01'], params['vo_w2'], params['vo_b2'],
              lv_w, lv_b, le_w, le_b)

    flops_round = 4 * M * N * dim + dim * dim * (20 * M + 24 * N)
    cost = pl.CostEstimate(
        flops=int(num_mp * flops_round + 10 * M * dim * dim),
        transcendentals=int(num_mp * 6 * (M + N) * dim),
        bytes_accessed=int(sum(int(x.size) * x.dtype.itemsize for x in inputs) + G * 4))

    out = pl.pallas_call(
        partial(dtsp_kernel, num_mp, dim),
        out_shape=jax.ShapeDtypeStruct((G, 1), jnp.float32),
        in_specs=[pl.BlockSpec(memory_space=pltpu.MemorySpace.VMEM) for _ in inputs],
        out_specs=pl.BlockSpec(memory_space=pltpu.MemorySpace.VMEM),
        cost_estimate=cost,
    )(*inputs)
    return out[:, 0]


# ----------------------------- parameters -----------------------------

def init_params(key, dim=32):
    d8, d4, d2 = dim // 8, dim // 4, dim // 2
    keys = list(jax.random.split(key, 40))
    ki = iter(keys)

    def lin(k, fin, fout):
        return jax.random.normal(k, (fin, fout), jnp.float32) * (1.0 / math.sqrt(fin))

    p = {}
    p['iw0'] = lin(next(ki), 2, d8);   p['ib0'] = jnp.zeros((1, d8), jnp.float32)
    p['iw1'] = lin(next(ki), d8, d4);  p['ib1'] = jnp.zeros((1, d4), jnp.float32)
    p['iw2'] = lin(next(ki), d4, d2);  p['ib2'] = jnp.zeros((1, d2), jnp.float32)
    p['iw3'] = lin(next(ki), d2, dim); p['ib3'] = jnp.zeros((1, dim), jnp.float32)
    p['emw'] = jnp.stack([lin(next(ki), dim, dim) for _ in range(3)])
    p['emb'] = jnp.zeros((3, 1, dim), jnp.float32)
    p['vmw'] = jnp.stack([lin(next(ki), dim, dim) for _ in range(3)])
    p['vmb'] = jnp.zeros((3, 1, dim), jnp.float32)
    p['vo_w01'] = jnp.stack([lin(next(ki), dim, dim) for _ in range(2)])
    p['vo_b01'] = jnp.zeros((2, 1, dim), jnp.float32)
    p['vo_w2'] = lin(next(ki), dim, 1)
    p['vo_b2'] = jnp.zeros((1, 1), jnp.float32)
    # LSTM weights stored as (4, dim, dim) = per-gate (i,f,g,o), pre-transposed for x @ W
    p['lv_wih'] = jnp.stack([lin(next(ki), dim, dim) for _ in range(4)])
    p['lv_whh'] = jnp.stack([lin(next(ki), dim, dim) for _ in range(4)])
    p['lv_b'] = jax.random.normal(next(ki), (4, 1, dim), jnp.float32) * 0.1
    p['le_wih'] = jnp.stack([lin(next(ki), dim, dim) for _ in range(4)])
    p['le_whh'] = jnp.stack([lin(next(ki), dim, dim) for _ in range(4)])
    p['le_b'] = jax.random.normal(next(ki), (4, 1, dim), jnp.float32) * 0.1
    p['v_init'] = jax.random.normal(next(ki), (1, dim), jnp.float32)
    return p


# ----------------------------- synthetic batch (glue, like create_batch) ---------

def build_batch(key, ns=(6, 6), dev=0.02):
    keys = jax.random.split(key, len(ns))
    n_total = int(sum(ns))
    EV_rows, W_list, C_list, seg_rows, n_edges = [], [], [], [], []
    v_off = 0
    for g, n in enumerate(ns):
        coords = jax.random.uniform(keys[g], (n, 2), jnp.float32)
        edges = [(i, j) for i in range(n) for j in range(i + 1, n)]
        m = len(edges)
        n_edges.append(m)
        for (i, j) in edges:
            row = [0.0] * n_total
            row[v_off + i] = 1.0
            row[v_off + j] = 1.0
            EV_rows.append(row)
            srow = [0.0] * len(ns)
            srow[g] = 1.0
            seg_rows.append(srow)
        dists = jnp.array([float(jnp.linalg.norm(coords[i] - coords[j])) for (i, j) in edges],
                          jnp.float32)
        W_list.append(dists.reshape(m, 1))
        cost = float(jnp.mean(dists))
        scale = (1.0 + dev) if (g % 2 == 1) else (1.0 - dev)
        C_list.append(jnp.full((m, 1), scale * cost, jnp.float32))
        v_off += n
    EV = jnp.array(EV_rows, jnp.float32)
    W = jnp.concatenate(W_list, axis=0)
    C = jnp.concatenate(C_list, axis=0)
    seg = jnp.array(seg_rows, jnp.float32)
    return EV, W, C, seg, jnp.array(n_edges, jnp.int32)


# ----------------------------- pure-JAX reference -----------------------------

def dtsp_reference(params, EV, W, C, seg, n_edges, num_mp):
    WC = jnp.concatenate([W, C], axis=1)
    h = jax.nn.relu(WC @ params['iw0'] + params['ib0'])
    h = jax.nn.relu(h @ params['iw1'] + params['ib1'])
    h = jax.nn.relu(h @ params['iw2'] + params['ib2'])
    E = h @ params['iw3'] + params['ib3']
    dim = params['v_init'].shape[1]
    V = jnp.broadcast_to(params['v_init'] / jnp.sqrt(jnp.float32(dim)), (EV.shape[1], dim))
    cE, cV = jnp.zeros_like(E), jnp.zeros_like(V)

    def mlp3(x, w, b):
        y = jax.nn.relu(x @ w[0] + b[0])
        y = jax.nn.relu(y @ w[1] + b[1])
        return y @ w[2] + b[2]

    def cell(x, hs, cs, wih, whh, b):
        gs = [x @ wih[k] + hs @ whh[k] + b[k] for k in range(4)]
        i, f = jax.nn.sigmoid(gs[0]), jax.nn.sigmoid(gs[1])
        g, o = jnp.tanh(gs[2]), jax.nn.sigmoid(gs[3])
        c2 = f * cs + i * g
        return o * jnp.tanh(c2), c2

    for _ in range(num_mp):
        msg_e = mlp3(E, params['emw'], params['emb'])
        V, cV = cell(EV.T @ msg_e, V, cV, params['lv_wih'], params['lv_whh'], params['lv_b'])
        msg_v = mlp3(V, params['vmw'], params['vmb'])
        E, cE = cell(EV @ msg_v, E, cE, params['le_wih'], params['le_whh'], params['le_b'])

    y = jax.nn.relu(E @ params['vo_w01'][0] + params['vo_b01'][0])
    y = jax.nn.relu(y @ params['vo_w01'][1] + params['vo_b01'][1])
    votes = y @ params['vo_w2'] + params['vo_b2']
    return (seg.T @ votes)[:, 0] / n_edges.astype(jnp.float32)


# ----------------------------- main -----------------------------

if __name__ == "__main__":
    key = jax.random.PRNGKey(0)
    kp, kb = jax.random.split(key)
    dim = 32
    num_mp = 8   # small message-passing count for the test (module default is 32)

    params = init_params(kp, dim=dim)
    EV, W, C, seg, n_edges = build_batch(kb, ns=(6, 6))   # 2 graphs, 6 vertices, 15 edges each

    votes = dtsp_forward(params, EV, W, C, seg, n_edges, num_mp)
    jax.block_until_ready(votes)

    ref = dtsp_reference(params, EV, W, C, seg, n_edges, num_mp)
    assert votes.shape == ref.shape == (2,)
    assert bool(jnp.all(jnp.isfinite(votes)))
    assert bool(jnp.allclose(votes, ref, atol=2e-3, rtol=2e-3)), (votes, ref)
    print("KERNEL_OK")
</pallas_src>

<mosaic_0001>
module attributes {stable_mosaic.version = 11 : i64} {
  func.func @dtsp_kernel(%arg0: memref<30x12xf32, #tpu.memory_space<vmem>>, %arg1: memref<12x30xf32, #tpu.memory_space<vmem>>, %arg2: memref<30x8xf32, #tpu.memory_space<vmem>>, %arg3: memref<2x30xf32, #tpu.memory_space<vmem>>, %arg4: memref<2x1xf32, #tpu.memory_space<vmem>>, %arg5: memref<12x1xf32, #tpu.memory_space<vmem>>, %arg6: memref<1x32xf32, #tpu.memory_space<vmem>>, %arg7: memref<8x4xf32, #tpu.memory_space<vmem>>, %arg8: memref<1x4xf32, #tpu.memory_space<vmem>>, %arg9: memref<4x8xf32, #tpu.memory_space<vmem>>, %arg10: memref<1x8xf32, #tpu.memory_space<vmem>>, %arg11: memref<8x16xf32, #tpu.memory_space<vmem>>, %arg12: memref<1x16xf32, #tpu.memory_space<vmem>>, %arg13: memref<16x32xf32, #tpu.memory_space<vmem>>, %arg14: memref<1x32xf32, #tpu.memory_space<vmem>>, %arg15: memref<3x32x32xf32, #tpu.memory_space<vmem>>, %arg16: memref<3x1x32xf32, #tpu.memory_space<vmem>>, %arg17: memref<3x32x32xf32, #tpu.memory_space<vmem>>, %arg18: memref<3x1x32xf32, #tpu.memory_space<vmem>>, %arg19: memref<2x32x32xf32, #tpu.memory_space<vmem>>, %arg20: memref<2x1x32xf32, #tpu.memory_space<vmem>>, %arg21: memref<32x1xf32, #tpu.memory_space<vmem>>, %arg22: memref<1x1xf32, #tpu.memory_space<vmem>>, %arg23: memref<64x128xf32, #tpu.memory_space<vmem>>, %arg24: memref<1x128xf32, #tpu.memory_space<vmem>>, %arg25: memref<64x128xf32, #tpu.memory_space<vmem>>, %arg26: memref<1x128xf32, #tpu.memory_space<vmem>>, %arg27: memref<2x1xf32, #tpu.memory_space<vmem>>) attributes {dimension_semantics = [], scalar_prefetch = 0 : i64, scratch_operands = 0 : i64, tpu.core_type = #tpu.core_type<tc>} {
    %c0 = arith.constant 0 : index
    %c0_0 = arith.constant 0 : index
    %0 = vector.load %arg0[%c0, %c0_0] : memref<30x12xf32, #tpu.memory_space<vmem>>, vector<30x12xf32>
    %c0_1 = arith.constant 0 : index
    %c0_2 = arith.constant 0 : index
    %1 = vector.load %arg1[%c0_1, %c0_2] : memref<12x30xf32, #tpu.memory_space<vmem>>, vector<12x30xf32>
    %c0_3 = arith.constant 0 : index
    %c0_4 = arith.constant 0 : index
    %2 = vector.load %arg2[%c0_3, %c0_4] : memref<30x8xf32, #tpu.memory_space<vmem>>, vector<30x8xf32>
    %c0_5 = arith.constant 0 : index
    %c0_6 = arith.constant 0 : index
    %3 = vector.load %arg5[%c0_5, %c0_6] : memref<12x1xf32, #tpu.memory_space<vmem>>, vector<12x1xf32>
    %c0_7 = arith.constant 0 : index
    %c0_8 = arith.constant 0 : index
    %4 = vector.load %arg7[%c0_7, %c0_8] : memref<8x4xf32, #tpu.memory_space<vmem>>, vector<8x4xf32>
    %cst = arith.constant dense<0.000000e+00> : vector<30x4xf32>
    %5 = tpu.matmul %2, %4, %cst {dimension_numbers = #tpu.dot_dimension_numbers<[1], [0], [0], [1], [0, 0, 1, 1], [], []>} : vector<30x8xf32>, vector<8x4xf32>, vector<30x4xf32> -> vector<30x4xf32>
    %c0_9 = arith.constant 0 : index
    %c0_10 = arith.constant 0 : index
    %6 = vector.load %arg8[%c0_9, %c0_10] : memref<1x4xf32, #tpu.memory_space<vmem>>, vector<1x4xf32>
    %7 = vector.broadcast %6 : vector<1x4xf32> to vector<30x4xf32>
    %8 = arith.addf %5, %7 : vector<30x4xf32>
    %cst_11 = arith.constant 0.000000e+00 : f32
    %9 = vector.broadcast %cst_11 : f32 to vector<30x4xf32>
    %10 = arith.maximumf %8, %9 : vector<30x4xf32>
    %c0_12 = arith.constant 0 : index
    %c0_13 = arith.constant 0 : index
    %11 = vector.load %arg9[%c0_12, %c0_13] : memref<4x8xf32, #tpu.memory_space<vmem>>, vector<4x8xf32>
    %cst_14 = arith.constant dense<0.000000e+00> : vector<30x8xf32>
    %12 = tpu.matmul %10, %11, %cst_14 {dimension_numbers = #tpu.dot_dimension_numbers<[1], [0], [0], [1], [0, 0, 1, 1], [], []>} : vector<30x4xf32>, vector<4x8xf32>, vector<30x8xf32> -> vector<30x8xf32>
    %c0_15 = arith.constant 0 : index
    %c0_16 = arith.constant 0 : index
    %13 = vector.load %arg10[%c0_15, %c0_16] : memref<1x8xf32, #tpu.memory_space<vmem>>, vector<1x8xf32>
    %14 = vector.broadcast %13 : vector<1x8xf32> to vector<30x8xf32>
    %15 = arith.addf %12, %14 : vector<30x8xf32>
    %cst_17 = arith.constant 0.000000e+00 : f32
    %16 = vector.broadcast %cst_17 : f32 to vector<30x8xf32>
    %17 = arith.maximumf %15, %16 : vector<30x8xf32>
    %c0_18 = arith.constant 0 : index
    %c0_19 = arith.constant 0 : index
    %18 = vector.load %arg11[%c0_18, %c0_19] : memref<8x16xf32, #tpu.memory_space<vmem>>, vector<8x16xf32>
    %cst_20 = arith.constant dense<0.000000e+00> : vector<30x16xf32>
    %19 = tpu.matmul %17, %18, %cst_20 {dimension_numbers = #tpu.dot_dimension_numbers<[1], [0], [0], [1], [0, 0, 1, 1], [], []>} : vector<30x8xf32>, vector<8x16xf32>, vector<30x16xf32> -> vector<30x16xf32>
    %c0_21 = arith.constant 0 : index
    %c0_22 = arith.constant 0 : index
    %20 = vector.load %arg12[%c0_21, %c0_22] : memref<1x16xf32, #tpu.memory_space<vmem>>, vector<1x16xf32>
    %21 = vector.broadcast %20 : vector<1x16xf32> to vector<30x16xf32>
    %22 = arith.addf %19, %21 : vector<30x16xf32>
    %cst_23 = arith.constant 0.000000e+00 : f32
    %23 = vector.broadcast %cst_23 : f32 to vector<30x16xf32>
    %24 = arith.maximumf %22, %23 : vector<30x16xf32>
    %c0_24 = arith.constant 0 : index
    %c0_25 = arith.constant 0 : index
    %25 = vector.load %arg13[%c0_24, %c0_25] : memref<16x32xf32, #tpu.memory_space<vmem>>, vector<16x32xf32>
    %cst_26 = arith.constant dense<0.000000e+00> : vector<30x32xf32>
    %26 = tpu.matmul %24, %25, %cst_26 {dimension_numbers = #tpu.dot_dimension_numbers<[1], [0], [0], [1], [0, 0, 1, 1], [], []>} : vector<30x16xf32>, vector<16x32xf32>, vector<30x32xf32> -> vector<30x32xf32>
    %c0_27 = arith.constant 0 : index
    %c0_28 = arith.constant 0 : index
    %27 = vector.load %arg14[%c0_27, %c0_28] : memref<1x32xf32, #tpu.memory_space<vmem>>, vector<1x32xf32>
    %28 = vector.broadcast %27 : vector<1x32xf32> to vector<30x32xf32>
    %29 = arith.addf %26, %28 : vector<30x32xf32>
    %c0_29 = arith.constant 0 : index
    %c0_30 = arith.constant 0 : index
    %30 = vector.load %arg6[%c0_29, %c0_30] : memref<1x32xf32, #tpu.memory_space<vmem>>, vector<1x32xf32>
    %31 = vector.shape_cast %30 : vector<1x32xf32> to vector<1x32xf32>
    %32 = vector.broadcast %31 : vector<1x32xf32> to vector<12x32xf32>
    %cst_31 = arith.constant 0.000000e+00 : f32
    %33 = vector.broadcast %cst_31 : f32 to vector<30x32xf32>
    %cst_32 = arith.constant 0.000000e+00 : f32
    %34 = vector.broadcast %cst_32 : f32 to vector<12x32xf32>
    %c0_33 = arith.constant 0 : index
    %c0_34 = arith.constant 0 : index
    %c0_35 = arith.constant 0 : index
    %35 = vector.load %arg15[%c0_33, %c0_34, %c0_35] : memref<3x32x32xf32, #tpu.memory_space<vmem>>, vector<3x32x32xf32>
    %c0_36 = arith.constant 0 : index
    %c0_37 = arith.constant 0 : index
    %c0_38 = arith.constant 0 : index
    %36 = vector.load %arg16[%c0_36, %c0_37, %c0_38] : memref<3x1x32xf32, #tpu.memory_space<vmem>>, vector<3x1x32xf32>
    %c0_39 = arith.constant 0 : index
    %c0_40 = arith.constant 0 : index
    %c0_41 = arith.constant 0 : index
    %37 = vector.load %arg17[%c0_39, %c0_40, %c0_41] : memref<3x32x32xf32, #tpu.memory_space<vmem>>, vector<3x32x32xf32>
    %c0_42 = arith.constant 0 : index
    %c0_43 = arith.constant 0 : index
    %c0_44 = arith.constant 0 : index
    %38 = vector.load %arg18[%c0_42, %c0_43, %c0_44] : memref<3x1x32xf32, #tpu.memory_space<vmem>>, vector<3x1x32xf32>
    %c0_45 = arith.constant 0 : index
    %c0_46 = arith.constant 0 : index
    %39 = vector.load %arg23[%c0_45, %c0_46] : memref<64x128xf32, #tpu.memory_space<vmem>>, vector<64x128xf32>
    %c0_47 = arith.constant 0 : index
    %c0_48 = arith.constant 0 : index
    %40 = vector.load %arg24[%c0_47, %c0_48] : memref<1x128xf32, #tpu.memory_space<vmem>>, vector<1x128xf32>
    %c0_49 = arith.constant 0 : index
    %c0_50 = arith.constant 0 : index
    %41 = vector.load %arg25[%c0_49, %c0_50] : memref<64x128xf32, #tpu.memory_space<vmem>>, vector<64x128xf32>
    %c0_51 = arith.constant 0 : index
    %c0_52 = arith.constant 0 : index
    %42 = vector.load %arg26[%c0_51, %c0_52] : memref<1x128xf32, #tpu.memory_space<vmem>>, vector<1x128xf32>
    %c0_i32 = arith.constant 0 : i32
    %c4_i32 = arith.constant 4 : i32
    %43 = arith.addi %c0_i32, %c4_i32 : i32
    %c1_i32 = arith.constant 1 : i32
    %44:4 = scf.for %arg28 = %c0_i32 to %43 step %c1_i32 iter_args(%arg29 = %29, %arg30 = %32, %arg31 = %33, %arg32 = %34) -> (vector<30x32xf32>, vector<12x32xf32>, vector<30x32xf32>, vector<12x32xf32>)  : i32 {
      %73 = vector.extract_strided_slice %35 {offsets = [0, 0, 0], sizes = [1, 32, 32], strides = [1, 1, 1]} : vector<3x32x32xf32> to vector<1x32x32xf32>
      %74 = vector.shape_cast %73 : vector<1x32x32xf32> to vector<32x32xf32>
      %cst_80 = arith.constant dense<0.000000e+00> : vector<30x32xf32>
      %75 = tpu.matmul %arg29, %74, %cst_80 {dimension_numbers = #tpu.dot_dimension_numbers<[1], [0], [0], [1], [0, 0, 1, 1], [], []>} : vector<30x32xf32>, vector<32x32xf32>, vector<30x32xf32> -> vector<30x32xf32>
      %76 = vector.extract_strided_slice %36 {offsets = [0, 0, 0], sizes = [1, 1, 32], strides = [1, 1, 1]} : vector<3x1x32xf32> to vector<1x1x32xf32>
      %77 = vector.shape_cast %76 : vector<1x1x32xf32> to vector<1x32xf32>
      %78 = vector.broadcast %77 : vector<1x32xf32> to vector<30x32xf32>
      %79 = arith.addf %75, %78 : vector<30x32xf32>
      %cst_81 = arith.constant 0.000000e+00 : f32
      %80 = vector.broadcast %cst_81 : f32 to vector<30x32xf32>
      %81 = arith.maximumf %79, %80 : vector<30x32xf32>
      %82 = vector.extract_strided_slice %35 {offsets = [1, 0, 0], sizes = [1, 32, 32], strides = [1, 1, 1]} : vector<3x32x32xf32> to vector<1x32x32xf32>
      %83 = vector.shape_cast %82 : vector<1x32x32xf32> to vector<32x32xf32>
      %cst_82 = arith.constant dense<0.000000e+00> : vector<30x32xf32>
      %84 = tpu.matmul %81, %83, %cst_82 {dimension_numbers = #tpu.dot_dimension_numbers<[1], [0], [0], [1], [0, 0, 1, 1], [], []>} : vector<30x32xf32>, vector<32x32xf32>, vector<30x32xf32> -> vector<30x32xf32>
      %85 = vector.extract_strided_slice %36 {offsets = [1, 0, 0], sizes = [1, 1, 32], strides = [1, 1, 1]} : vector<3x1x32xf32> to vector<1x1x32xf32>
      %86 = vector.shape_cast %85 : vector<1x1x32xf32> to vector<1x32xf32>
      %87 = vector.broadcast %86 : vector<1x32xf32> to vector<30x32xf32>
      %88 = arith.addf %84, %87 : vector<30x32xf32>
      %cst_83 = arith.constant 0.000000e+00 : f32
      %89 = vector.broadcast %cst_83 : f32 to vector<30x32xf32>
      %90 = arith.maximumf %88, %89 : vector<30x32xf32>
      %cst_84 = arith.constant dense<0.000000e+00> : vector<12x32xf32>
      %91 = tpu.matmul %1, %90, %cst_84 {dimension_numbers = #tpu.dot_dimension_numbers<[1], [0], [0], [1], [0, 0, 1, 1], [], []>} : vector<12x30xf32>, vector<30x32xf32>, vector<12x32xf32> -> vector<12x32xf32>
      %92 = vector.extract_strided_slice %35 {offsets = [2, 0, 0], sizes = [1, 32, 32], strides = [1, 1, 1]} : vector<3x32x32xf32> to vector<1x32x32xf32>
      %93 = vector.shape_cast %92 : vector<1x32x32xf32> to vector<32x32xf32>
      %cst_85 = arith.constant dense<0.000000e+00> : vector<12x32xf32>
      %94 = tpu.matmul %91, %93, %cst_85 {dimension_numbers = #tpu.dot_dimension_numbers<[1], [0], [0], [1], [0, 0, 1, 1], [], []>} : vector<12x32xf32>, vector<32x32xf32>, vector<12x32xf32> -> vector<12x32xf32>
      %95 = vector.extract_strided_slice %36 {offsets = [2, 0, 0], sizes = [1, 1, 32], strides = [1, 1, 1]} : vector<3x1x32xf32> to vector<1x1x32xf32>
      %96 = vector.shape_cast %95 : vector<1x1x32xf32> to vector<1x32xf32>
      %97 = vector.broadcast %3 : vector<12x1xf32> to vector<12x32xf32>
      %98 = vector.broadcast %96 : vector<1x32xf32> to vector<12x32xf32>
      %99 = arith.mulf %97, %98 : vector<12x32xf32>
      %100 = arith.addf %94, %99 : vector<12x32xf32>
      %101 = tpu.concatenate %100, %arg30 in 1 : vector<12x32xf32>, vector<12x32xf32> -> vector<12x64xf32>
      %cst_86 = arith.constant dense<0.000000e+00> : vector<12x128xf32>
      %102 = tpu.matmul %101, %39, %cst_86 {dimension_numbers = #tpu.dot_dimension_numbers<[1], [0], [0], [1], [0, 0, 1, 1], [], []>} : vector<12x64xf32>, vector<64x128xf32>, vector<12x128xf32> -> vector<12x128xf32>
      %103 = vector.broadcast %40 : vector<1x128xf32> to vector<12x128xf32>
      %104 = arith.addf %102, %103 : vector<12x128xf32>
      %105 = vector.extract_strided_slice %104 {offsets = [0, 0], sizes = [12, 32], strides = [1, 1]} : vector<12x128xf32> to vector<12x32xf32>
      %106 = arith.negf %105 : vector<12x32xf32>
      %107 = math.exp %106 : vector<12x32xf32>
      %cst_87 = arith.constant 1.000000e+00 : f32
      %108 = vector.broadcast %cst_87 : f32 to vector<12x32xf32>
      %109 = arith.addf %108, %107 : vector<12x32xf32>
      %110 = arith.divf %108, %109 : vector<12x32xf32>
      %111 = vector.extract_strided_slice %104 {offsets = [0, 32], sizes = [12, 32], strides = [1, 1]} : vector<12x128xf32> to vector<12x32xf32>
      %112 = arith.negf %111 : vector<12x32xf32>
      %113 = math.exp %112 : vector<12x32xf32>
      %cst_88 = arith.constant 1.000000e+00 : f32
      %114 = vector.broadcast %cst_88 : f32 to vector<12x32xf32>
      %115 = arith.addf %114, %113 : vector<12x32xf32>
      %116 = arith.divf %114, %115 : vector<12x32xf32>
      %117 = vector.extract_strided_slice %104 {offsets = [0, 64], sizes = [12, 32], strides = [1, 1]} : vector<12x128xf32> to vector<12x32xf32>
      %118 = math.tanh %117 : vector<12x32xf32>
      %119 = vector.extract_strided_slice %104 {offsets = [0, 96], sizes = [12, 32], strides = [1, 1]} : vector<12x128xf32> to vector<12x32xf32>
      %120 = arith.negf %119 : vector<12x32xf32>
      %121 = math.exp %120 : vector<12x32xf32>
      %cst_89 = arith.constant 1.000000e+00 : f32
      %122 = vector.broadcast %cst_89 : f32 to vector<12x32xf32>
      %123 = arith.addf %122, %121 : vector<12x32xf32>
      %124 = arith.divf %122, %123 : vector<12x32xf32>
      %125 = arith.mulf %116, %arg32 : vector<12x32xf32>
      %126 = arith.mulf %110, %118 : vector<12x32xf32>
      %127 = arith.addf %125, %126 : vector<12x32xf32>
      %128 = math.tanh %127 : vector<12x32xf32>
      %129 = arith.mulf %124, %128 : vector<12x32xf32>
      %130 = vector.extract_strided_slice %37 {offsets = [0, 0, 0], sizes = [1, 32, 32], strides = [1, 1, 1]} : vector<3x32x32xf32> to vector<1x32x32xf32>
      %131 = vector.shape_cast %130 : vector<1x32x32xf32> to vector<32x32xf32>
      %cst_90 = arith.constant dense<0.000000e+00> : vector<12x32xf32>
      %132 = tpu.matmul %129, %131, %cst_90 {dimension_numbers = #tpu.dot_dimension_numbers<[1], [0], [0], [1], [0, 0, 1, 1], [], []>} : vector<12x32xf32>, vector<32x32xf32>, vector<12x32xf32> -> vector<12x32xf32>
      %133 = vector.extract_strided_slice %38 {offsets = [0, 0, 0], sizes = [1, 1, 32], strides = [1, 1, 1]} : vector<3x1x32xf32> to vector<1x1x32xf32>
      %134 = vector.shape_cast %133 : vector<1x1x32xf32> to vector<1x32xf32>
      %135 = vector.broadcast %134 : vector<1x32xf32> to vector<12x32xf32>
      %136 = arith.addf %132, %135 : vector<12x32xf32>
      %cst_91 = arith.constant 0.000000e+00 : f32
      %137 = vector.broadcast %cst_91 : f32 to vector<12x32xf32>
      %138 = arith.maximumf %136, %137 : vector<12x32xf32>
      %139 = vector.extract_strided_slice %37 {offsets = [1, 0, 0], sizes = [1, 32, 32], strides = [1, 1, 1]} : vector<3x32x32xf32> to vector<1x32x32xf32>
      %140 = vector.shape_cast %139 : vector<1x32x32xf32> to vector<32x32xf32>
      %cst_92 = arith.constant dense<0.000000e+00> : vector<12x32xf32>
      %141 = tpu.matmul %138, %140, %cst_92 {dimension_numbers = #tpu.dot_dimension_numbers<[1], [0], [0], [1], [0, 0, 1, 1], [], []>} : vector<12x32xf32>, vector<32x32xf32>, vector<12x32xf32> -> vector<12x32xf32>
      %142 = vector.extract_strided_slice %38 {offsets = [1, 0, 0], sizes = [1, 1, 32], strides = [1, 1, 1]} : vector<3x1x32xf32> to vector<1x1x32xf32>
      %143 = vector.shape_cast %142 : vector<1x1x32xf32> to vector<1x32xf32>
      %144 = vector.broadcast %143 : vector<1x32xf32> to vector<12x32xf32>
      %145 = arith.addf %141, %144 : vector<12x32xf32>
      %cst_93 = arith.constant 0.000000e+00 : f32
      %146 = vector.broadcast %cst_93 : f32 to vector<12x32xf32>
      %147 = arith.maximumf %145, %146 : vector<12x32xf32>
      %148 = vector.extract_strided_slice %37 {offsets = [2, 0, 0], sizes = [1, 32, 32], strides = [1, 1, 1]} : vector<3x32x32xf32> to vector<1x32x32xf32>
      %149 = vector.shape_cast %148 : vector<1x32x32xf32> to vector<32x32xf32>
      %cst_94 = arith.constant dense<0.000000e+00> : vector<12x32xf32>
      %150 = tpu.matmul %147, %149, %cst_94 {dimension_numbers = #tpu.dot_dimension_numbers<[1], [0], [0], [1], [0, 0, 1, 1], [], []>} : vector<12x32xf32>, vector<32x32xf32>, vector<12x32xf32> -> vector<12x32xf32>
      %151 = vector.extract_strided_slice %38 {offsets = [2, 0, 0], sizes = [1, 1, 32], strides = [1, 1, 1]} : vector<3x1x32xf32> to vector<1x1x32xf32>
      %152 = vector.shape_cast %151 : vector<1x1x32xf32> to vector<1x32xf32>
      %153 = vector.broadcast %152 : vector<1x32xf32> to vector<12x32xf32>
      %154 = arith.addf %150, %153 : vector<12x32xf32>
      %cst_95 = arith.constant dense<0.000000e+00> : vector<30x32xf32>
      %155 = tpu.matmul %0, %154, %cst_95 {dimension_numbers = #tpu.dot_dimension_numbers<[1], [0], [0], [1], [0, 0, 1, 1], [], []>} : vector<30x12xf32>, vector<12x32xf32>, vector<30x32xf32> -> vector<30x32xf32>
      %156 = tpu.concatenate %155, %arg29 in 1 : vector<30x32xf32>, vector<30x32xf32> -> vector<30x64xf32>
      %cst_96 = arith.constant dense<0.000000e+00> : vector<30x128xf32>
      %157 = tpu.matmul %156, %41, %cst_96 {dimension_numbers = #tpu.dot_dimension_numbers<[1], [0], [0], [1], [0, 0, 1, 1], [], []>} : vector<30x64xf32>, vector<64x128xf32>, vector<30x128xf32> -> vector<30x128xf32>
      %158 = vector.broadcast %42 : vector<1x128xf32> to vector<30x128xf32>
      %159 = arith.addf %157, %158 : vector<30x128xf32>
      %160 = vector.extract_strided_slice %159 {offsets = [0, 0], sizes = [30, 32], strides = [1, 1]} : vector<30x128xf32> to vector<30x32xf32>
      %161 = arith.negf %160 : vector<30x32xf32>
      %162 = math.exp %161 : vector<30x32xf32>
      %cst_97 = arith.constant 1.000000e+00 : f32
      %163 = vector.broadcast %cst_97 : f32 to vector<30x32xf32>
      %164 = arith.addf %163, %162 : vector<30x32xf32>
      %165 = arith.divf %163, %164 : vector<30x32xf32>
      %166 = vector.extract_strided_slice %159 {offsets = [0, 32], sizes = [30, 32], strides = [1, 1]} : vector<30x128xf32> to vector<30x32xf32>
      %167 = arith.negf %166 : vector<30x32xf32>
      %168 = math.exp %167 : vector<30x32xf32>
      %cst_98 = arith.constant 1.000000e+00 : f32
      %169 = vector.broadcast %cst_98 : f32 to vector<30x32xf32>
      %170 = arith.addf %169, %168 : vector<30x32xf32>
      %171 = arith.divf %169, %170 : vector<30x32xf32>
      %172 = vector.extract_strided_slice %159 {offsets = [0, 64], sizes = [30, 32], strides = [1, 1]} : vector<30x128xf32> to vector<30x32xf32>
      %173 = math.tanh %172 : vector<30x32xf32>
      %174 = vector.extract_strided_slice %159 {offsets = [0, 96], sizes = [30, 32], strides = [1, 1]} : vector<30x128xf32> to vector<30x32xf32>
      %175 = arith.negf %174 : vector<30x32xf32>
      %176 = math.exp %175 : vector<30x32xf32>
      %cst_99 = arith.constant 1.000000e+00 : f32
      %177 = vector.broadcast %cst_99 : f32 to vector<30x32xf32>
      %178 = arith.addf %177, %176 : vector<30x32xf32>
      %179 = arith.divf %177, %178 : vector<30x32xf32>
      %180 = arith.mulf %171, %arg31 : vector<30x32xf32>
      %181 = arith.mulf %165, %173 : vector<30x32xf32>
      %182 = arith.addf %180, %181 : vector<30x32xf32>
      %183 = math.tanh %182 : vector<30x32xf32>
      %184 = arith.mulf %179, %183 : vector<30x32xf32>
      %185 = vector.extract_strided_slice %35 {offsets = [0, 0, 0], sizes = [1, 32, 32], strides = [1, 1, 1]} : vector<3x32x32xf32> to vector<1x32x32xf32>
      %186 = vector.shape_cast %185 : vector<1x32x32xf32> to vector<32x32xf32>
      %cst_100 = arith.constant dense<0.000000e+00> : vector<30x32xf32>
      %187 = tpu.matmul %184, %186, %cst_100 {dimension_numbers = #tpu.dot_dimension_numbers<[1], [0], [0], [1], [0, 0, 1, 1], [], []>} : vector<30x32xf32>, vector<32x32xf32>, vector<30x32xf32> -> vector<30x32xf32>
      %188 = vector.extract_strided_slice %36 {offsets = [0, 0, 0], sizes = [1, 1, 32], strides = [1, 1, 1]} : vector<3x1x32xf32> to vector<1x1x32xf32>
      %189 = vector.shape_cast %188 : vector<1x1x32xf32> to vector<1x32xf32>
      %190 = vector.broadcast %189 : vector<1x32xf32> to vector<30x32xf32>
      %191 = arith.addf %187, %190 : vector<30x32xf32>
      %cst_101 = arith.constant 0.000000e+00 : f32
      %192 = vector.broadcast %cst_101 : f32 to vector<30x32xf32>
      %193 = arith.maximumf %191, %192 : vector<30x32xf32>
      %194 = vector.extract_strided_slice %35 {offsets = [1, 0, 0], sizes = [1, 32, 32], strides = [1, 1, 1]} : vector<3x32x32xf32> to vector<1x32x32xf32>
      %195 = vector.shape_cast %194 : vector<1x32x32xf32> to vector<32x32xf32>
      %cst_102 = arith.constant dense<0.000000e+00> : vector<30x32xf32>
      %196 = tpu.matmul %193, %195, %cst_102 {dimension_numbers = #tpu.dot_dimension_numbers<[1], [0], [0], [1], [0, 0, 1, 1], [], []>} : vector<30x32xf32>, vector<32x32xf32>, vector<30x32xf32> -> vector<30x32xf32>
      %197 = vector.extract_strided_slice %36 {offsets = [1, 0, 0], sizes = [1, 1, 32], strides = [1, 1, 1]} : vector<3x1x32xf32> to vector<1x1x32xf32>
      %198 = vector.shape_cast %197 : vector<1x1x32xf32> to vector<1x32xf32>
      %199 = vector.broadcast %198 : vector<1x32xf32> to vector<30x32xf32>
      %200 = arith.addf %196, %199 : vector<30x32xf32>
      %cst_103 = arith.constant 0.000000e+00 : f32
      %201 = vector.broadcast %cst_103 : f32 to vector<30x32xf32>
      %202 = arith.maximumf %200, %201 : vector<30x32xf32>
      %cst_104 = arith.constant dense<0.000000e+00> : vector<12x32xf32>
      %203 = tpu.matmul %1, %202, %cst_104 {dimension_numbers = #tpu.dot_dimension_numbers<[1], [0], [0], [1], [0, 0, 1, 1], [], []>} : vector<12x30xf32>, vector<30x32xf32>, vector<12x32xf32> -> vector<12x32xf32>
      %204 = vector.extract_strided_slice %35 {offsets = [2, 0, 0], sizes = [1, 32, 32], strides = [1, 1, 1]} : vector<3x32x32xf32> to vector<1x32x32xf32>
      %205 = vector.shape_cast %204 : vector<1x32x32xf32> to vector<32x32xf32>
      %cst_105 = arith.constant dense<0.000000e+00> : vector<12x32xf32>
      %206 = tpu.matmul %203, %205, %cst_105 {dimension_numbers = #tpu.dot_dimension_numbers<[1], [0], [0], [1], [0, 0, 1, 1], [], []>} : vector<12x32xf32>, vector<32x32xf32>, vector<12x32xf32> -> vector<12x32xf32>
      %207 = vector.extract_strided_slice %36 {offsets = [2, 0, 0], sizes = [1, 1, 32], strides = [1, 1, 1]} : vector<3x1x32xf32> to vector<1x1x32xf32>
      %208 = vector.shape_cast %207 : vector<1x1x32xf32> to vector<1x32xf32>
      %209 = vector.broadcast %3 : vector<12x1xf32> to vector<12x32xf32>
      %210 = vector.broadcast %208 : vector<1x32xf32> to vector<12x32xf32>
      %211 = arith.mulf %209, %210 : vector<12x32xf32>
      %212 = arith.addf %206, %211 : vector<12x32xf32>
      %213 = tpu.concatenate %212, %129 in 1 : vector<12x32xf32>, vector<12x32xf32> -> vector<12x64xf32>
      %cst_106 = arith.constant dense<0.000000e+00> : vector<12x128xf32>
      %214 = tpu.matmul %213, %39, %cst_106 {dimension_numbers = #tpu.dot_dimension_numbers<[1], [0], [0], [1], [0, 0, 1, 1], [], []>} : vector<12x64xf32>, vector<64x128xf32>, vector<12x128xf32> -> vector<12x128xf32>
      %215 = vector.broadcast %40 : vector<1x128xf32> to vector<12x128xf32>
      %216 = arith.addf %214, %215 : vector<12x128xf32>
      %217 = vector.extract_strided_slice %216 {offsets = [0, 0], sizes = [12, 32], strides = [1, 1]} : vector<12x128xf32> to vector<12x32xf32>
      %218 = arith.negf %217 : vector<12x32xf32>
      %219 = math.exp %218 : vector<12x32xf32>
      %cst_107 = arith.constant 1.000000e+00 : f32
      %220 = vector.broadcast %cst_107 : f32 to vector<12x32xf32>
      %221 = arith.addf %220, %219 : vector<12x32xf32>
      %222 = arith.divf %220, %221 : vector<12x32xf32>
      %223 = vector.extract_strided_slice %216 {offsets = [0, 32], sizes = [12, 32], strides = [1, 1]} : vector<12x128xf32> to vector<12x32xf32>
      %224 = arith.negf %223 : vector<12x32xf32>
      %225 = math.exp %224 : vector<12x32xf32>
      %cst_108 = arith.constant 1.000000e+00 : f32
      %226 = vector.broadcast %cst_108 : f32 to vector<12x32xf32>
      %227 = arith.addf %226, %225 : vector<12x32xf32>
      %228 = arith.divf %226, %227 : vector<12x32xf32>
      %229 = vector.extract_strided_slice %216 {offsets = [0, 64], sizes = [12, 32], strides = [1, 1]} : vector<12x128xf32> to vector<12x32xf32>
      %230 = math.tanh %229 : vector<12x32xf32>
      %231 = vector.extract_strided_slice %216 {offsets = [0, 96], sizes = [12, 32], strides = [1, 1]} : vector<12x128xf32> to vector<12x32xf32>
      %232 = arith.negf %231 : vector<12x32xf32>
      %233 = math.exp %232 : vector<12x32xf32>
      %cst_109 = arith.constant 1.000000e+00 : f32
      %234 = vector.broadcast %cst_109 : f32 to vector<12x32xf32>
      %235 = arith.addf %234, %233 : vector<12x32xf32>
      %236 = arith.divf %234, %235 : vector<12x32xf32>
      %237 = arith.mulf %228, %127 : vector<12x32xf32>
      %238 = arith.mulf %222, %230 : vector<12x32xf32>
      %239 = arith.addf %237, %238 : vector<12x32xf32>
      %240 = math.tanh %239 : vector<12x32xf32>
      %241 = arith.mulf %236, %240 : vector<12x32xf32>
      %242 = vector.extract_strided_slice %37 {offsets = [0, 0, 0], sizes = [1, 32, 32], strides = [1, 1, 1]} : vector<3x32x32xf32> to vector<1x32x32xf32>
      %243 = vector.shape_cast %242 : vector<1x32x32xf32> to vector<32x32xf32>
      %cst_110 = arith.constant dense<0.000000e+00> : vector<12x32xf32>
      %244 = tpu.matmul %241, %243, %cst_110 {dimension_numbers = #tpu.dot_dimension_numbers<[1], [0], [0], [1], [0, 0, 1, 1], [], []>} : vector<12x32xf32>, vector<32x32xf32>, vector<12x32xf32> -> vector<12x32xf32>
      %245 = vector.extract_strided_slice %38 {offsets = [0, 0, 0], sizes = [1, 1, 32], strides = [1, 1, 1]} : vector<3x1x32xf32> to vector<1x1x32xf32>
      %246 = vector.shape_cast %245 : vector<1x1x32xf32> to vector<1x32xf32>
      %247 = vector.broadcast %246 : vector<1x32xf32> to vector<12x32xf32>
      %248 = arith.addf %244, %247 : vector<12x32xf32>
      %cst_111 = arith.constant 0.000000e+00 : f32
      %249 = vector.broadcast %cst_111 : f32 to vector<12x32xf32>
      %250 = arith.maximumf %248, %249 : vector<12x32xf32>
      %251 = vector.extract_strided_slice %37 {offsets = [1, 0, 0], sizes = [1, 32, 32], strides = [1, 1, 1]} : vector<3x32x32xf32> to vector<1x32x32xf32>
      %252 = vector.shape_cast %251 : vector<1x32x32xf32> to vector<32x32xf32>
      %cst_112 = arith.constant dense<0.000000e+00> : vector<12x32xf32>
      %253 = tpu.matmul %250, %252, %cst_112 {dimension_numbers = #tpu.dot_dimension_numbers<[1], [0], [0], [1], [0, 0, 1, 1], [], []>} : vector<12x32xf32>, vector<32x32xf32>, vector<12x32xf32> -> vector<12x32xf32>
      %254 = vector.extract_strided_slice %38 {offsets = [1, 0, 0], sizes = [1, 1, 32], strides = [1, 1, 1]} : vector<3x1x32xf32> to vector<1x1x32xf32>
      %255 = vector.shape_cast %254 : vector<1x1x32xf32> to vector<1x32xf32>
      %256 = vector.broadcast %255 : vector<1x32xf32> to vector<12x32xf32>
      %257 = arith.addf %253, %256 : vector<12x32xf32>
      %cst_113 = arith.constant 0.000000e+00 : f32
      %258 = vector.broadcast %cst_113 : f32 to vector<12x32xf32>
      %259 = arith.maximumf %257, %258 : vector<12x32xf32>
      %260 = vector.extract_strided_slice %37 {offsets = [2, 0, 0], sizes = [1, 32, 32], strides = [1, 1, 1]} : vector<3x32x32xf32> to vector<1x32x32xf32>
      %261 = vector.shape_cast %260 : vector<1x32x32xf32> to vector<32x32xf32>
      %cst_114 = arith.constant dense<0.000000e+00> : vector<12x32xf32>
      %262 = tpu.matmul %259, %261, %cst_114 {dimension_numbers = #tpu.dot_dimension_numbers<[1], [0], [0], [1], [0, 0, 1, 1], [], []>} : vector<12x32xf32>, vector<32x32xf32>, vector<12x32xf32> -> vector<12x32xf32>
      %263 = vector.extract_strided_slice %38 {offsets = [2, 0, 0], sizes = [1, 1, 32], strides = [1, 1, 1]} : vector<3x1x32xf32> to vector<1x1x32xf32>
      %264 = vector.shape_cast %263 : vector<1x1x32xf32> to vector<1x32xf32>
      %265 = vector.broadcast %264 : vector<1x32xf32> to vector<12x32xf32>
      %266 = arith.addf %262, %265 : vector<12x32xf32>
      %cst_115 = arith.constant dense<0.000000e+00> : vector<30x32xf32>
      %267 = tpu.matmul %0, %266, %cst_115 {dimension_numbers = #tpu.dot_dimension_numbers<[1], [0], [0], [1], [0, 0, 1, 1], [], []>} : vector<30x12xf32>, vector<12x32xf32>, vector<30x32xf32> -> vector<30x32xf32>
      %268 = tpu.concatenate %267, %184 in 1 : vector<30x32xf32>, vector<30x32xf32> -> vector<30x64xf32>
      %cst_116 = arith.constant dense<0.000000e+00> : vector<30x128xf32>
      %269 = tpu.matmul %268, %41, %cst_116 {dimension_numbers = #tpu.dot_dimension_numbers<[1], [0], [0], [1], [0, 0, 1, 1], [], []>} : vector<30x64xf32>, vector<64x128xf32>, vector<30x128xf32> -> vector<30x128xf32>
      %270 = vector.broadcast %42 : vector<1x128xf32> to vector<30x128xf32>
      %271 = arith.addf %269, %270 : vector<30x128xf32>
      %272 = vector.extract_strided_slice %271 {offsets = [0, 0], sizes = [30, 32], strides = [1, 1]} : vector<30x128xf32> to vector<30x32xf32>
      %273 = arith.negf %272 : vector<30x32xf32>
      %274 = math.exp %273 : vector<30x32xf32>
      %cst_117 = arith.constant 1.000000e+00 : f32
      %275 = vector.broadcast %cst_117 : f32 to vector<30x32xf32>
      %276 = arith.addf %275, %274 : vector<30x32xf32>
      %277 = arith.divf %275, %276 : vector<30x32xf32>
      %278 = vector.extract_strided_slice %271 {offsets = [0, 32], sizes = [30, 32], strides = [1, 1]} : vector<30x128xf32> to vector<30x32xf32>
      %279 = arith.negf %278 : vector<30x32xf32>
      %280 = math.exp %279 : vector<30x32xf32>
      %cst_118 = arith.constant 1.000000e+00 : f32
      %281 = vector.broadcast %cst_118 : f32 to vector<30x32xf32>
      %282 = arith.addf %281, %280 : vector<30x32xf32>
      %283 = arith.divf %281, %282 : vector<30x32xf32>
      %284 = vector.extract_strided_slice %271 {offsets = [0, 64], sizes = [30, 32], strides = [1, 1]} : vector<30x128xf32> to vector<30x32xf32>
      %285 = math.tanh %284 : vector<30x32xf32>
      %286 = vector.extract_strided_slice %271 {offsets = [0, 96], sizes = [30, 32], strides = [1, 1]} : vector<30x128xf32> to vector<30x32xf32>
      %287 = arith.negf %286 : vector<30x32xf32>
      %288 = math.exp %287 : vector<30x32xf32>
      %cst_119 = arith.constant 1.000000e+00 : f32
      %289 = vector.broadcast %cst_119 : f32 to vector<30x32xf32>
      %290 = arith.addf %289, %288 : vector<30x32xf32>
      %291 = arith.divf %289, %290 : vector<30x32xf32>
      %292 = arith.mulf %283, %182 : vector<30x32xf32>
      %293 = arith.mulf %277, %285 : vector<30x32xf32>
      %294 = arith.addf %292, %293 : vector<30x32xf32>
      %295 = math.tanh %294 : vector<30x32xf32>
      %296 = arith.mulf %291, %295 : vector<30x32xf32>
      scf.yield %296, %241, %294, %239 : vector<30x32xf32>, vector<12x32xf32>, vector<30x32xf32>, vector<12x32xf32>
    }
    %c0_53 = arith.constant 0 : index
    %c0_54 = arith.constant 0 : index
    %c0_55 = arith.constant 0 : index
    %45 = vector.load %arg19[%c0_53, %c0_54, %c0_55] : memref<2x32x32xf32, #tpu.memory_space<vmem>>, vector<1x32x32xf32>
    %46 = vector.shape_cast %45 : vector<1x32x32xf32> to vector<32x32xf32>
    %cst_56 = arith.constant dense<0.000000e+00> : vector<30x32xf32>
    %47 = tpu.matmul %44#0, %46, %cst_56 {dimension_numbers = #tpu.dot_dimension_numbers<[1], [0], [0], [1], [0, 0, 1, 1], [], []>} : vector<30x32xf32>, vector<32x32xf32>, vector<30x32xf32> -> vector<30x32xf32>
    %c0_57 = arith.constant 0 : index
    %c0_58 = arith.constant 0 : index
    %c0_59 = arith.constant 0 : index
    %48 = vector.load %arg20[%c0_57, %c0_58, %c0_59] : memref<2x1x32xf32, #tpu.memory_space<vmem>>, vector<1x1x32xf32>
    %49 = vector.shape_cast %48 : vector<1x1x32xf32> to vector<1x32xf32>
    %50 = vector.broadcast %49 : vector<1x32xf32> to vector<30x32xf32>
    %51 = arith.addf %47, %50 : vector<30x32xf32>
    %cst_60 = arith.constant 0.000000e+00 : f32
    %52 = vector.broadcast %cst_60 : f32 to vector<30x32xf32>
    %53 = arith.maximumf %51, %52 : vector<30x32xf32>
    %c1 = arith.constant 1 : index
    %c0_61 = arith.constant 0 : index
    %c0_62 = arith.constant 0 : index
    %54 = vector.load %arg19[%c1, %c0_61, %c0_62] : memref<2x32x32xf32, #tpu.memory_space<vmem>>, vector<1x32x32xf32>
    %55 = vector.shape_cast %54 : vector<1x32x32xf32> to vector<32x32xf32>
    %cst_63 = arith.constant dense<0.000000e+00> : vector<30x32xf32>
    %56 = tpu.matmul %53, %55, %cst_63 {dimension_numbers = #tpu.dot_dimension_numbers<[1], [0], [0], [1], [0, 0, 1, 1], [], []>} : vector<30x32xf32>, vector<32x32xf32>, vector<30x32xf32> -> vector<30x32xf32>
    %c1_64 = arith.constant 1 : index
    %c0_65 = arith.constant 0 : index
    %c0_66 = arith.constant 0 : index
    %57 = vector.load %arg20[%c1_64, %c0_65, %c0_66] : memref<2x1x32xf32, #tpu.memory_space<vmem>>, vector<1x1x32xf32>
    %58 = vector.shape_cast %57 : vector<1x1x32xf32> to vector<1x32xf32>
    %59 = vector.broadcast %58 : vector<1x32xf32> to vector<30x32xf32>
    %60 = arith.addf %56, %59 : vector<30x32xf32>
    %cst_67 = arith.constant 0.000000e+00 : f32
    %61 = vector.broadcast %cst_67 : f32 to vector<30x32xf32>
    %62 = arith.maximumf %60, %61 : vector<30x32xf32>
    %c0_68 = arith.constant 0 : index
    %c0_69 = arith.constant 0 : index
    %63 = vector.load %arg3[%c0_68, %c0_69] : memref<2x30xf32, #tpu.memory_space<vmem>>, vector<2x30xf32>
    %cst_70 = arith.constant dense<0.000000e+00> : vector<2x32xf32>
    %64 = tpu.matmul %63, %62, %cst_70 {dimension_numbers = #tpu.dot_dimension_numbers<[1], [0], [0], [1], [0, 0, 1, 1], [], []>} : vector<2x30xf32>, vector<30x32xf32>, vector<2x32xf32> -> vector<2x32xf32>
    %c0_71 = arith.constant 0 : index
    %c0_72 = arith.constant 0 : index
    %65 = vector.load %arg21[%c0_71, %c0_72] : memref<32x1xf32, #tpu.memory_space<vmem>>, vector<32x1xf32>
    %cst_73 = arith.constant dense<0.000000e+00> : vector<2x1xf32>
    %66 = tpu.matmul %64, %65, %cst_73 {dimension_numbers = #tpu.dot_dimension_numbers<[1], [0], [0], [1], [0, 0, 1, 1], [], []>} : vector<2x32xf32>, vector<32x1xf32>, vector<2x1xf32> -> vector<2x1xf32>
    %c0_74 = arith.constant 0 : index
    %c0_75 = arith.constant 0 : index
    %67 = vector.load %arg4[%c0_74, %c0_75] : memref<2x1xf32, #tpu.memory_space<vmem>>, vector<2x1xf32>
    %68 = arith.mulf %66, %67 : vector<2x1xf32>
    %c0_76 = arith.constant 0 : index
    %c0_77 = arith.constant 0 : index
    %69 = vector.load %arg22[%c0_76, %c0_77] : memref<1x1xf32, #tpu.memory_space<vmem>>, vector<1x1xf32>
    %70 = vector.broadcast %69 : vector<1x1xf32> to vector<2x1xf32>
    %71 = arith.addf %68, %70 : vector<2x1xf32>
    %c0_78 = arith.constant 0 : index
    %c0_79 = arith.constant 0 : index
    %72 = vector.load %arg27[%c0_78, %c0_79] : memref<2x1xf32, #tpu.memory_space<vmem>>, vector<2x1xf32>
    tpu.vector_store %arg27[%c0_78, %c0_79], %71 {strides = array<i32>} : memref<2x1xf32, #tpu.memory_space<vmem>>, vector<2x1xf32>,
    return
  }
}

</mosaic_0001>

<bundles_post_ra>
// kernel: tpu_custom_call.1
= control target key start
LH: loop header
LB: loop body
LE: loop exit
PB: predicated region body
PF: predicated region fallthrough
CT: control target
= control target key end

     0   :  { %s3812_s0 = inlined_call_operand.vmem [shape: f32[30,12], index: 0, kind: input, shape index: {}]   ;;  %s3813_s1 = inlined_call_operand.hbm [shape: f32[12,30], index: 1, kind: input, shape index: {}]   ;;  %s3814_s2 = inlined_call_operand.vmem [shape: f32[30,8], index: 2, kind: input, shape index: {}]   ;;  %s3815_s3 = inlined_call_operand.hbm [shape: f32[2,30], index: 3, kind: input, shape index: {}]   ;;  %s3816_s4 = inlined_call_operand.vmem [shape: f32[2,1], index: 4, kind: input, shape index: {}]   ;;  %s3817_s5 = inlined_call_operand.vmem [shape: f32[12,1], index: 5, kind: input, shape index: {}]   ;;  %s3818_s6 = inlined_call_operand.hbm [shape: f32[1,32], index: 6, kind: input, shape index: {}]   ;;  %s3819_s7 = inlined_call_operand.vmem [shape: f32[8,4], index: 7, kind: input, shape index: {}]   ;;  %s3820_s8 = inlined_call_operand.hbm [shape: f32[1,4], index: 8, kind: input, shape index: {}]   ;;  %s3821_s9 = inlined_call_operand.hbm [shape: f32[4,8], index: 9, kind: input, shape index: {}]   ;;  %s3822_s10 = inlined_call_operand.hbm [shape: f32[1,8], index: 10, kind: input, shape index: {}]   ;;  %s3823_s11 = inlined_call_operand.vmem [shape: f32[8,16], index: 11, kind: input, shape index: {}]   ;;  %s3824_s12 = inlined_call_operand.hbm [shape: f32[1,16], index: 12, kind: input, shape index: {}]   ;;  %s3825_s13 = inlined_call_operand.hbm [shape: f32[16,32], index: 13, kind: input, shape index: {}]   ;;  %s3826_s14 = inlined_call_operand.hbm [shape: f32[1,32], index: 14, kind: input, shape index: {}]   ;;  %s3827_s15 = inlined_call_operand.vmem [shape: f32[3,32,32], index: 15, kind: input, shape index: {}]   ;;  %s3828_s16 = inlined_call_operand.hbm [shape: f32[3,1,32], index: 16, kind: input, shape index: {}]   ;;  %s3829_s17 = inlined_call_operand.hbm [shape: f32[3,32,32], index: 17, kind: input, shape index: {}]   ;;  %s3830_s18 = inlined_call_operand.vmem [shape: f32[3,1,32], index: 18, kind: input, shape index: {}]   ;;  %s3831_s19 = inlined_call_operand.vmem [shape: f32[2,32,32], index: 19, kind: input, shape index: {}]   ;;  %s3832_s20 = inlined_call_operand.vmem [shape: f32[2,1,32], index: 20, kind: input, shape index: {}]   ;;  %s3833_s21 = inlined_call_operand.vmem [shape: f32[32,1], index: 21, kind: input, shape index: {}]   ;;  %s3834_s22 = inlined_call_operand.<no memory space> [shape: f32[1,1], index: 22, kind: input, shape index: {}]   ;;  %s3835_s23 = inlined_call_operand.hbm [shape: f32[64,128], index: 23, kind: input, shape index: {}]   ;;  %s3836_s24 = inlined_call_operand.vmem [shape: f32[1,128], index: 24, kind: input, shape index: {}]   ;;  %s3837_s25 = inlined_call_operand.hbm [shape: f32[64,128], index: 25, kind: input, shape index: {}]   ;;  %s3838_s26 = inlined_call_operand.vmem [shape: f32[1,128], index: 26, kind: input, shape index: {}]   ;;  %s3839_s27 = inlined_call_operand.vmem [shape: f32[2,1], index: 27, kind: output, shape index: {}]  }
   0x1   :  { %3869 = sst [smem:[#allocation67_spill]] %s3812_s0  ;;  %v32_v0 = vstv %s3834_s22 }
   0x2   :  { %3870 = sst [smem:[#allocation68_spill]] %s3813_s1  ;;  %33 = vst [vmem:[#allocation2] sm:$0x1] %v32_v0 }
   0x3   :  { %3871 = sst [smem:[#allocation69_spill]] %s3814_s2 }
   0x4   :  { %3872 = sst [smem:[#allocation70_spill]] %s3815_s3 }
   0x5   :  { %3873 = sst [smem:[#allocation71_spill]] %s3816_s4 }
   0x6   :  { %3874 = sst [smem:[#allocation72_spill]] %s3817_s5 }
   0x7   :  { %3875 = sst [smem:[#allocation73_spill]] %s3818_s6 }
   0x8   :  { %3876 = sst [smem:[#allocation74_spill]] %s3819_s7 }
   0x9   :  { %3877 = sst [smem:[#allocation75_spill]] %s3820_s8 }
   0xa   :  { %3878 = sst [smem:[#allocation76_spill]] %s3821_s9 }
   0xb   :  { %3879 = sst [smem:[#allocation77_spill]] %s3822_s10 }
   0xc   :  { %3880 = sst [smem:[#allocation78_spill]] %s3823_s11 }
   0xd   :  { %3881 = sst [smem:[#allocation79_spill]] %s3839_s27 }
   0xe   :  { %34 = vsyncpa [#allocation4], 0 }
   0xf   :  { %35 = vsyncpa [#allocation6], 0 }
  0x10   :  { %36 = vsyncpa [#allocation9], 0 }
  0x11   :  { %37 = vsyncpa [#allocation12], 0 }
  0x12   :  { %38 = vsyncpa [#allocation15], 0 }
  0x13   :  { %39 = vsyncpa [#allocation18], 0  ;;  %s3882_s9 = sld [smem:[#allocation70_spill]] }
  0x19   :  { %s63_s5 = sshll.u32 %s3882_s9, 4  ;;  %s64_s5 = int_to_ptr.hbm [resolvable:$true] %s63_s5 }
  0x1a   :  { %40 = vsyncpa [#allocation21], 0  ;;  %s2832_s28 = smov [#allocation5]   ;;  %s3883_s1 = sld [smem:[#allocation75_spill]] }
  0x1b   :  { %s65_s0 = sshll.u32 %s2832_s28, 4  ;;  %s2833_s6 = smov [#allocation8]   ;;  %s66_s0 = int_to_ptr.vmem [resolvable:$true] %s65_s0 }
  0x1c   :  { %68 = dma.hbm_to_vmem [thread:$0]  %s64_s5, 32, %s66_s0, [#allocation6]  }
  0x1d   :  { %s93_s11 = sshll.u32 %s2833_s6, 4  ;;  %s3884_s7 = sld [smem:[#allocation77_spill]]  ;;  %s94_s11 = int_to_ptr.vmem [resolvable:$true] %s93_s11 }
  0x1e   :  { %s2834_s8 = smov [#allocation11]   ;;  %s136_s27 = sshll.u32 %s3825_s13, 4  ;;  %s137_s27 = int_to_ptr.hbm [resolvable:$true] %s136_s27 }
  0x1f   :  { %s115_s30 = sshll.u32 %s2834_s8, 4  ;;  %s2835_s5 = smov [#allocation14]   ;;  %s116_s30 = int_to_ptr.vmem [resolvable:$true] %s115_s30 }
  0x20   :  { %s91_s22 = sshll.u32 %s3883_s1, 4  ;;  %s138_s0 = sshll.u32 %s2835_s5, 4  ;;  %s92_s22 = int_to_ptr.hbm [resolvable:$true] %s91_s22  ;;  %s139_s0 = int_to_ptr.vmem [resolvable:$true] %s138_s0 }
  0x21   :  { %96 = dma.hbm_to_vmem [thread:$0]  %s92_s22, 16, %s94_s11, [#allocation9]  }
  0x22   :  { %s162_s1 = sshll.u32 %s3828_s16, 4  ;;  %s2836_s6 = smov 128   ;;  %s163_s1 = int_to_ptr.hbm [resolvable:$true] %s162_s1 }
  0x23   :  { %s113_s4 = sshll.u32 %s3884_s7, 4  ;;  %s2837_s2 = smov 8   ;;  %s114_s4 = int_to_ptr.hbm [resolvable:$true] %s113_s4 }
  0x24   :  { %118 = dma.hbm_to_vmem [thread:$0]  %s114_s4, 16, %s116_s30, [#allocation12]  }
  0x25   :  { %144 = dma.hbm_to_vmem [thread:$0]  %s137_s27, 256, %s139_s0, [#allocation15], %s2836_s6, %s2836_s6, %s2837_s2  }
  0x26   :  { %s2838_s22 = smov [#allocation17]   ;;  %s198_s7 = sshll.u32 %s3835_s23, 4  ;;  %s199_s7 = int_to_ptr.hbm [resolvable:$true] %s198_s7 }
  0x27   :  { %s164_s11 = sshll.u32 %s2838_s22, 4  ;;  %s2839_s4 = smov 16   ;;  %s165_s11 = int_to_ptr.vmem [resolvable:$true] %s164_s11 }
  0x28   :  { %s2840_s8 = smov 1   ;;  %s2841_s16 = smov [#allocation20]  }
  0x29   :  { %170 = dma.hbm_to_vmem [thread:$0]  %s163_s1, 48, %s165_s11, [#allocation18], %s2839_s4, %s2839_s4, %s2840_s8  }
  0x2a   :  { %s200_s30 = sshll.u32 %s2841_s16, 4  ;;  %s3885_s5 = sld [smem:[#allocation68_spill]]  ;;  %s201_s30 = int_to_ptr.vmem [resolvable:$true] %s200_s30 }
  0x2b   :  { %206 = dma.hbm_to_vmem [thread:$0]  %s199_s7, 1024, %s201_s30, [#allocation21], %s2836_s6, %s2836_s6, %s2837_s2  }
  0x2c   :  { %s3886_s29 = sld [smem:[#allocation73_spill]]  ;;  %s2842_s22 = smov [#allocation3]  }
  0x2d   :  { %s49_s13 = sshll.u32 %s2842_s22, 4  ;;  %s2843_s1 = smov [#allocation7]   ;;  %s50_s13 = int_to_ptr.vmem [resolvable:$true] %s49_s13 }
  0x2e   :  { %s80_s11 = sshll.u32 %s2843_s1, 4  ;;  %s3887_s8 = sld [smem:[#allocation76_spill]]  ;;  %s81_s11 = int_to_ptr.vmem [resolvable:$true] %s80_s11 }
  0x2f   :  { %s126_s9 = sshll.u32 %s3824_s12, 4  ;;  %s2844_s28 = smov [#allocation10]   ;;  %s127_s9 = int_to_ptr.hbm [resolvable:$true] %s126_s9 }
  0x30   :  { %s47_s10 = sshll.u32 %s3885_s5, 4  ;;  %s104_s5 = sshll.u32 %s2844_s28, 4  ;;  %s48_s10 = int_to_ptr.hbm [resolvable:$true] %s47_s10  ;;  %s105_s5 = int_to_ptr.vmem [resolvable:$true] %s104_s5 }
  0x31   :  { %55 = dma.hbm_to_vmem [thread:$0]  %s48_s10, 256, %s50_s13, [#allocation4], %s2836_s6, %s2836_s6, %s2837_s2  }
  0x32   :  { %s78_s23 = sshll.u32 %s3886_s29, 4  ;;  %s2845_s27 = smov [#allocation13]   ;;  %s79_s23 = int_to_ptr.hbm [resolvable:$true] %s78_s23 }
  0x33   :  { %83 = dma.hbm_to_vmem [thread:$0]  %s79_s23, 16, %s81_s11, [#allocation6]  }
  0x34   :  { %s102_s16 = sshll.u32 %s3887_s8, 4  ;;  %s128_s10 = sshll.u32 %s2845_s27, 4  ;;  %s103_s16 = int_to_ptr.hbm [resolvable:$true] %s102_s16  ;;  %s129_s10 = int_to_ptr.vmem [resolvable:$true] %s128_s10 }
  0x35   :  { %107 = dma.hbm_to_vmem [thread:$0]  %s103_s16, 64, %s105_s5, [#allocation9]  }
  0x36   :  { %s150_s22 = sshll.u32 %s3826_s14, 4  ;;  %s175_s1 = sshll.u32 %s3829_s17, 4  ;;  %s151_s22 = int_to_ptr.hbm [resolvable:$true] %s150_s22  ;;  %s176_s1 = int_to_ptr.hbm [resolvable:$true] %s175_s1 }
  0x37   :  { %131 = dma.hbm_to_vmem [thread:$0]  %s127_s9, 16, %s129_s10, [#allocation12]  }
  0x38   :  { %s2846_s11 = smov [#allocation16]   ;;  %s2847_s3 = smov [#allocation19]  }
  0x39   :  { %s152_s12 = sshll.u32 %s2846_s11, 4  ;;  %s177_s4 = sshll.u32 %s2847_s3, 4  ;;  %s153_s12 = int_to_ptr.vmem [resolvable:$true] %s152_s12  ;;  %s178_s4 = int_to_ptr.vmem [resolvable:$true] %s177_s4 }
  0x3a   :  { %155 = dma.hbm_to_vmem [thread:$0]  %s151_s22, 16, %s153_s12, [#allocation15]  }
  0x3b   :  { %s213_s7 = sshll.u32 %s3837_s25, 4  ;;  %s2848_s14 = smov [#allocation22]   ;;  %s214_s7 = int_to_ptr.hbm [resolvable:$true] %s213_s7 }
  0x3c   :  { %183 = dma.hbm_to_vmem [thread:$0]  %s176_s1, 1536, %s178_s4, [#allocation18], %s2836_s6, %s2836_s6, %s2837_s2  }
  0x3d   :  { %s215_s30 = sshll.u32 %s2848_s14, 4  ;;  %s216_s30 = int_to_ptr.vmem [resolvable:$true] %s215_s30 }
  0x3e   :  { %221 = dma.hbm_to_vmem [thread:$0]  %s214_s7, 1024, %s216_s30, [#allocation21], %s2836_s6, %s2836_s6, %s2837_s2  }
  0x3f   :  { %2766 = dma.done.wait [#allocation4], 256  }
  0x40   :  { %2767 = vsyncadd [#allocation4], 4294967040 }
  0x41   :  { %2768 = dma.done.wait [#allocation6], 48  }
  0x42   :  { %2769 = vsyncadd [#allocation6], 4294967248 }
  0x43   :  { %2770 = dma.done.wait [#allocation9], 80  }
  0x44   :  { %2771 = vsyncadd [#allocation9], 4294967216 }
  0x45   :  { %2772 = dma.done.wait [#allocation12], 32  }
  0x46   :  { %2773 = vsyncadd [#allocation12], 4294967264 }
  0x47   :  { %2774 = dma.done.wait [#allocation15], 272  }
  0x48   :  { %2775 = vsyncadd [#allocation15], 4294967024 }
  0x49   :  { %2776 = dma.done.wait [#allocation18], 1584  }
  0x4a   :  { %2777 = vsyncadd [#allocation18], 4294965712 }
  0x4b   :  { %2778 = dma.done.wait [#allocation21], 2048  }
  0x4c   :  { %2779 = vsyncadd [#allocation21], 4294965248  ;;  %s3888_s9 = sld [smem:[#allocation67_spill]]  ;;  %v3069_v5 = vld [vmem:[#allocation3] sm:$0xff]  ;;  %v3071_v6 = vld [vmem:[#allocation3 + $0x8] sm:$0xf] }
  0x4d   :  { %3893 = vst [vmem:[#allocation34_spill] sm:$0xff] %v3071_v6  ;;  %s3894_s22 = sld [smem:[#allocation72_spill]]  ;;  %v3083_v9 = vld [vmem:[#allocation7] ss:$0 sm:$0xff]   ;;  %v3088_v10 = vld [vmem:[%s3827_s15] sm:$0xff]  ;;  %v3093_v11 = vld [vmem:[%s3827_s15 + $0x8] sm:$0xff] }
  0x4e   :  { %3897 = vst [vmem:[#allocation37_spill] sm:$0xff] %v3088_v10  ;;  %v3098_v12 = vld [vmem:[%s3827_s15 + $0x10] sm:$0xff]  ;;  %v3103_v13 = vld [vmem:[%s3827_s15 + $0x18] sm:$0xff]  ;;  %v3108_v14 = vld [vmem:[%s3827_s15 + $0x20] sm:$0xff]  ;;  %vm293_vm0 = vcmask 64512   ;;  %s3924_s30 = sld [smem:[#allocation74_spill]] }
  0x4f   :  { %3898 = vst [vmem:[#allocation38_spill] sm:$0xff] %v3093_v11  ;;  %v3113_v15 = vld [vmem:[%s3827_s15 + $0x28] sm:$0xff]  ;;  %v3118_v16 = vld [vmem:[%s3827_s15 + $0x30] sm:$0xff]  ;;  %v3123_v17 = vld [vmem:[%s3827_s15 + $0x38] sm:$0xff]  ;;  %vm357_vm1 = vcmask 1043456   ;;  %vm344_vm2 = vcmask 31744  }
  0x50   :  { %3899 = vst [vmem:[#allocation39_spill] sm:$0xff] %v3098_v12  ;;  %v3128_v18 = vld [vmem:[%s3827_s15 + $0x40] sm:$0xff]  ;;  %v3133_v19 = vld [vmem:[%s3827_s15 + $0x48] sm:$0xff]  ;;  %v3138_v20 = vld [vmem:[%s3827_s15 + $0x50] sm:$0xff]  ;;  %s3926_s29 = sld [smem:[#allocation78_spill]]  ;;  %vm450_vm3 = vcmask 130048  }
  0x51   :  { %3900 = vst [vmem:[#allocation40_spill] sm:$0xff] %v3103_v13  ;;  %v3143_v21 = vld [vmem:[%s3827_s15 + $0x58] sm:$0xff]  ;;  %v3145_v22 = vld [vmem:[#allocation17] sm:$0x1]  ;;  %v3147_v23 = vld [vmem:[#allocation17 + $0x1] sm:$0x1] }
  0x52   :  { %v3052_v1 = vld [vmem:[%s3888_s9] sm:$0xff]  ;;  %v3057_v2 = vld [vmem:[%s3888_s9 + $0x8] sm:$0xff]  ;;  %v3062_v3 = vld [vmem:[%s3888_s9 + $0x10] sm:$0xff]  ;;  %3901 = vst [vmem:[#allocation41_spill] sm:$0xff] %v3108_v14 }
  0x53   :  { %3889 = vst [vmem:[#allocation30_spill] sm:$0xff] %v3052_v1  ;;  %v3067_v4 = vld [vmem:[%s3888_s9 + $0x18] sm:$0x3f]  ;;  %v3076_v7 = vld [vmem:[%s3894_s22] sm:$0xff]  ;;  %v3081_v8 = vld [vmem:[%s3894_s22 + $0x8] sm:$0xf] }
  0x54   :  { %3890 = vst [vmem:[#allocation31_spill] sm:$0xff] %v3057_v2  ;;  %v3149_v24 = vld [vmem:[#allocation17 + $0x2] sm:$0x1]  ;;  %v3151_v25 = vld [vmem:[#allocation19] sm:$0xff]  ;;  %v3153_v26 = vld [vmem:[#allocation19 + $0x8] sm:$0xff]  ;;  %s3925_s9 = sld [smem:[#allocation69_spill]] }
  0x55   :  { %3891 = vst [vmem:[#allocation32_spill] sm:$0xff] %v3062_v3  ;;  %v3155_v27 = vld [vmem:[#allocation19 + $0x10] sm:$0xff]  ;;  %v3157_v28 = vld [vmem:[#allocation19 + $0x18] sm:$0xff]  ;;  %v3159_v29 = vld [vmem:[#allocation19 + $0x20] sm:$0xff]  ;;  %s3285_s22 = smov 0  }
  0x56   :  { %3892 = vst [vmem:[#allocation33_spill] sm:$0xff] %v3067_v4  ;;  %v3161_v30 = vld [vmem:[#allocation19 + $0x28] sm:$0xff]  ;;  %v3163_v31 = vld [vmem:[#allocation19 + $0x30] sm:$0xff]  ;;  %v3165_v32 = vld [vmem:[#allocation19 + $0x38] sm:$0xff] }
  0x57   :  { %3895 = vst [vmem:[#allocation35_spill] sm:$0xff] %v3076_v7  ;;  %v3167_v33 = vld [vmem:[#allocation19 + $0x40] sm:$0xff]  ;;  %v3169_v34 = vld [vmem:[#allocation19 + $0x48] sm:$0xff]  ;;  %v3171_v35 = vld [vmem:[#allocation19 + $0x50] sm:$0xff] }
  0x58   :  { %3896 = vst [vmem:[#allocation36_spill] sm:$0xff] %v3081_v8  ;;  %v3173_v36 = vld [vmem:[#allocation19 + $0x58] sm:$0xff]  ;;  %v3178_v37 = vld [vmem:[%s3830_s18] sm:$0x1]  ;;  %v3183_v38 = vld [vmem:[%s3830_s18 + $0x1] sm:$0x1] }
  0x59   :  { %3902 = vst [vmem:[#allocation42_spill] sm:$0xff] %v3113_v15  ;;  %v3188_v39 = vld [vmem:[%s3830_s18 + $0x2] sm:$0x1]  ;;  %v3190_v40 = vld [vmem:[#allocation20] sm:$0xff]  ;;  %v3194_v42 = vld [vmem:[#allocation20 + $0x10] sm:$0xff] }
  0x5a   :  { %3903 = vst [vmem:[#allocation43_spill] sm:$0xff] %v3118_v16  ;;  %v3192_v41 = vld [vmem:[#allocation20 + $0x8] sm:$0xff]  ;;  %v3196_v43 = vld [vmem:[#allocation20 + $0x18] sm:$0xff]  ;;  %v3198_v44 = vld [vmem:[#allocation20 + $0x20] sm:$0xff] }
  0x5b   :  { %3904 = vst [vmem:[#allocation44_spill] sm:$0xff] %v3123_v17  ;;  %v3200_v45 = vld [vmem:[#allocation20 + $0x28] sm:$0xff]  ;;  %v3202_v46 = vld [vmem:[#allocation20 + $0x30] sm:$0xff]  ;;  %v3204_v47 = vld [vmem:[#allocation20 + $0x38] sm:$0xff] }
  0x5c   :  { %3905 = vst [vmem:[#allocation45_spill] sm:$0xff] %v3128_v18  ;;  %v3209_v48 = vld [vmem:[%s3836_s24] sm:$0x1]  ;;  %v3211_v49 = vld [vmem:[#allocation22] sm:$0xff]  ;;  %v3215_v51 = vld [vmem:[#allocation22 + $0x10] sm:$0xff] }
  0x5d   :  { %3906 = vst [vmem:[#allocation46_spill] sm:$0xff] %v3133_v19  ;;  %v3213_v50 = vld [vmem:[#allocation22 + $0x8] sm:$0xff]  ;;  %v3217_v52 = vld [vmem:[#allocation22 + $0x18] sm:$0xff]  ;;  %v3219_v53 = vld [vmem:[#allocation22 + $0x20] sm:$0xff] }
  0x5e   :  { %3907 = vst [vmem:[#allocation47_spill] sm:$0xff] %v3138_v20  ;;  %v3221_v54 = vld [vmem:[#allocation22 + $0x28] sm:$0xff]  ;;  %v3223_v55 = vld [vmem:[#allocation22 + $0x30] sm:$0xff]  ;;  %v3225_v56 = vld [vmem:[#allocation22 + $0x38] sm:$0xff] }
  0x5f   :  { %3908 = vst [vmem:[#allocation48_spill] sm:$0xff] %v3143_v21  ;;  %v3230_v57 = vld [vmem:[%s3838_s26] sm:$0x1]  ;;  %v283_v60 = vld [vmem:[%s3925_s9 + $0x8] sm:$0xff]  ;;  %v284_v61 = vld [vmem:[%s3925_s9 + $0x10] sm:$0xff] }
  0x60   :  { %3909 = vst [vmem:[#allocation49_spill] sm:$0xff] %v3145_v22  ;;  %v288_v58 = vld [vmem:[%s3924_s30] sm:$0xff]  ;;  %v285_v62 = vld [vmem:[%s3925_s9 + $0x18] sm:$0x3f]  ;;  %v2297_v0 = vld [vmem:[#allocation8] ss:$0 sm:$0xff] }
  0x61   :  { %3910 = vst [vmem:[#allocation50_spill] sm:$0xff] %v3147_v23  ;;  %v282_v59 = vld [vmem:[%s3925_s9] sm:$0xff]  ;;  %321 = vmatpush.msra.mxu0 %v288_v58  ;;  %v339_v63 = vld [vmem:[#allocation10] sm:$0xf] }
  0x62   :  { %3911 = vst [vmem:[#allocation51_spill] sm:$0xff] %v3149_v24  ;;  %2051 = vmatmul.msk.f32.vlgmr.msra.gmra.mxu0 %vm293_vm0, %v282_v59  ;;  %2055 = vmatpush.msk.msra.mxu1 %vm357_vm1, %v339_v63  ;;  %v394_v63 = vld [vmem:[%s3926_s29] sm:$0xff] }
  0x63   :  { %3912 = vst [vmem:[#allocation52_spill] sm:$0xff] %v3151_v25  ;;  %426 = vmatpush.msra.mxu2 %v394_v63  ;;  %v444_v63 = vld [vmem:[#allocation14] sm:$0xff] }
  0x64   :  { %3913 = vst [vmem:[#allocation53_spill] sm:$0xff] %v3153_v26 }
  0x65   :  { %3914 = vst [vmem:[#allocation54_spill] sm:$0xff] %v3155_v27 }
  0x66   :  { %3915 = vst [vmem:[#allocation55_spill] sm:$0xff] %v3157_v28 }
  0x67   :  { %3916 = vst [vmem:[#allocation56_spill] sm:$0xff] %v3159_v29 }
  0x68   :  { %3917 = vst [vmem:[#allocation57_spill] sm:$0xff] %v3178_v37 }
  0x69   :  { %3918 = vst [vmem:[#allocation58_spill] sm:$0xff] %v3183_v38 }
  0x6a   :  { %3919 = vst [vmem:[#allocation59_spill] sm:$0xff] %v3188_v39  ;;  %2052 = vmatmul.msk.f32.gmra.mxu0 %vm293_vm0, %v283_v60 }
  0x6b   :  { %3920 = vst [vmem:[#allocation60_spill] sm:$0xff] %v3209_v48 }
  0x6c   :  { %3921 = vst [vmem:[#allocation61_spill] sm:$0xff] %v3211_v49 }
  0x6d   :  { %3922 = vst [vmem:[#allocation62_spill] sm:$0xff] %v3213_v50 }
  0x6e   :  { %3923 = vst [vmem:[#allocation63_spill] sm:$0xff] %v3230_v57 }
  0x72   :  { %2053 = vmatmul.msk.f32.gmra.mxu0 %vm293_vm0, %v284_v61 }
  0x7a   :  { %2054 = vmatmul.msk.f32.gmra.mxu0 %vm293_vm0, %v285_v62 }
  0xdf   :  { %v323_v58 = vpop.f32.mrf.mxu0 }
  0xe0   :  { %v324_v59 = vadd.f32 %v2297_v0, %v323_v58  ;;  %v2298_v58 = vld [vmem:[#allocation11] ss:$0 sm:$0xff] }
  0xe2   :  { %v335_v60 = vmax.f32 %v324_v59, 0.0 }
  0xe4   :  { %2056 = vmatmul.msk.f32.vlgmr.msra.gmra.mxu1 %vm344_vm2, %v335_v60 }
  0xe7   :  { %v326_v57 = vpop.f32.mrf.mxu0 }
  0xe8   :  { %v327_v4 = vadd.f32 %v2297_v0, %v326_v57 }
  0xea   :  { %v336_v3 = vmax.f32 %v327_v4, 0.0 }
  0xec   :  { %2057 = vmatmul.msk.f32.gmra.mxu1 %vm344_vm2, %v336_v3 }
  0xef   :  { %v329_v61 = vpop.f32.mrf.mxu0 }
  0xf0   :  { %v330_v2 = vadd.f32 %v2297_v0, %v329_v61 }
  0xf2   :  { %v337_v1 = vmax.f32 %v330_v2, 0.0 }
  0xf4   :  { %2058 = vmatmul.msk.f32.gmra.mxu1 %vm344_vm2, %v337_v1 }
  0xf7   :  { %v332_v39 = vpop.f32.mrf.mxu0 }
  0xf8   :  { %v333_v62 = vadd.f32 %v2297_v0, %v332_v39 }
  0xfa   :  { %v338_v38 = vmax.f32 %v333_v62, 0.0  ;;  %v445_v62 = vld [vmem:[#allocation14 + $0x8] sm:$0xff] }
  0xfb   :  { %477 = vmatpush.msra.mxu3 %v445_v62  ;;  %v2300_v62 = vld [vmem:[#allocation16] ss:$0 sm:$0xff] }
  0xfc   :  { %2059 = vmatmul.msk.f32.gmra.mxu1 %vm344_vm2, %v338_v38 }
  0xfd   :  { %478 = vmatpush.msra.mxu3 %v444_v63 }
 0x161   :  { %v378_v59 = vpop.f32.mrf.mxu1 }
 0x162   :  { %v379_v60 = vadd.f32 %v2298_v58, %v378_v59 }
 0x164   :  { %v390_v37 = vmax.f32 %v379_v60, 0.0 }
 0x166   :  { %2060 = vmatmul.msk.f32.vlgmr.msra.gmra.mxu2 %vm293_vm0, %v390_v37  ;;  %v2299_v37 = vld [vmem:[#allocation13] ss:$0 sm:$0xff] }
 0x169   :  { %v381_v3 = vpop.f32.mrf.mxu1 }
 0x16a   :  { %v382_v4 = vadd.f32 %v2298_v58, %v381_v3 }
 0x16c   :  { %v391_v57 = vmax.f32 %v382_v4, 0.0 }
 0x16e   :  { %2061 = vmatmul.msk.f32.gmra.mxu2 %vm293_vm0, %v391_v57 }
 0x171   :  { %v384_v1 = vpop.f32.mrf.mxu1 }
 0x172   :  { %v385_v2 = vadd.f32 %v2298_v58, %v384_v1 }
 0x174   :  { %v392_v39 = vmax.f32 %v385_v2, 0.0 }
 0x176   :  { %2062 = vmatmul.msk.f32.gmra.mxu2 %vm293_vm0, %v392_v39 }
 0x179   :  { %v387_v38 = vpop.f32.mrf.mxu1 }
 0x17a   :  { %v388_v0 = vadd.f32 %v2298_v58, %v387_v38 }
 0x17c   :  { %v393_v61 = vmax.f32 %v388_v0, 0.0 }
 0x17e   :  { %2063 = vmatmul.msk.f32.gmra.mxu2 %vm293_vm0, %v393_v61 }
 0x1e9   :  { %v428_v59 = vpop.f32.mrf.mxu2 }
 0x1ea   :  { %v429_v60 = vadd.f32 %v2299_v37, %v428_v59 }
 0x1ec   :  { %v440_v3 = vmax.f32 %v429_v60, 0.0 }
 0x1ee   :  { %2064 = vmatmul.msk.f32.vlgmr.msra.gmra.mxu3 %vm450_vm3, %v440_v3 }
 0x1f1   :  { %v431_v4 = vpop.f32.mrf.mxu2 }
 0x1f2   :  { %v432_v57 = vadd.f32 %v2299_v37, %v431_v4  ;;  %v3259_v4 = vmov 0.0  }
 0x1f4   :  { %v441_v1 = vmax.f32 %v432_v57, 0.0  ;;  %v3261_v57 = vmov 0.0  }
 0x1f6   :  { %2065 = vmatmul.msk.f32.gmra.mxu3 %vm450_vm3, %v441_v1  ;;  %v3263_v1 = vmov 0.0  }
 0x1f9   :  { %v434_v2 = vpop.f32.mrf.mxu2 }
 0x1fa   :  { %v435_v39 = vadd.f32 %v2299_v37, %v434_v2  ;;  %v3265_v2 = vmov 0.0  }
 0x1fc   :  { %v442_v58 = vmax.f32 %v435_v39, 0.0  ;;  %v3269_v39 = vmov 0.0  }
 0x1fe   :  { %2066 = vmatmul.msk.f32.gmra.mxu3 %vm450_vm3, %v442_v58  ;;  %v3927_v58 = vmov %v3083_v9 }
 0x201   :  { %v437_v38 = vpop.f32.mrf.mxu2 }
 0x202   :  { %v438_v0 = vadd.f32 %v2299_v37, %v437_v38  ;;  %v3267_v37 = vmov 0.0  }
 0x204   :  { %v443_v61 = vmax.f32 %v438_v0, 0.0 }
 0x206   :  { %2067 = vmatmul.msk.f32.gmra.mxu3 %vm450_vm3, %v443_v61 }
 0x271   :  { %v480_v63 = vpop.f32.mrf.mxu3 }
 0x272   :  { %v481_v48 = vadd.f32 %v2300_v62, %v480_v63  }
 0x279   :  { %v483_v24 = vpop.f32.mrf.mxu3 }
 0x27a   :  { %v484_v59 = vadd.f32 %v2300_v62, %v483_v24  }
 0x281   :  { %v486_v49 = vpop.f32.mrf.mxu3 }
 0x282   :  { %v487_v60 = vadd.f32 %v2300_v62, %v486_v49  }
 0x289   :  { %v489_v3 = vpop.f32.mrf.mxu3 }
 0x28a   :  { %v490_v50 = vadd.f32 %v2300_v62, %v489_v3  }
 0x28b LB: > { %v3928_v28 = vld [vmem:[#allocation55_spill] sm:$0xff]  ;;  %v3929_v27 = vld [vmem:[#allocation54_spill] sm:$0xff]  ;;  %v3930_v26 = vld [vmem:[#allocation53_spill] sm:$0xff]  ;;  %vm565_vm4 = vcmask 261120   ;;  %vm666_vm5 = vcmask 1045504   ;;  %vm659_vm6 = vcmask 244736   ;;  %v2790_v1 = vphi %v3263_v1, %v1782_v1   ;;  %v2786_v57 = vphi %v3261_v57, %v3638_v57   ;;  %v2782_v4 = vphi %v3259_v4, %v3633_v4   ;;  %s2830_s22 = sphi %s3285_s22, %s549_s22   ;;  %v2826_v48 = vphi %v481_v48, %v3979_v48   ;;  %v2822_v59 = vphi %v484_v59, %v3978_v59   ;;  %v2818_v60 = vphi %v487_v60, %v3977_v60   ;;  %v2814_v50 = vphi %v490_v50, %v3976_v50   ;;  %v2810_v9 = vphi %v3083_v9, %v3652_v9   ;;  %v2806_v58 = vphi %v3927_v58, %v3656_v58   ;;  %v2802_v39 = vphi %v3269_v39, %v1779_v39   ;;  %v2798_v37 = vphi %v3267_v37, %v1780_v37   ;;  %v2794_v2 = vphi %v3265_v2, %v3975_v2  }
 0x28c   : > { %v3931_v25 = vld [vmem:[#allocation52_spill] sm:$0xff]  ;;  %v3933_v20 = vld [vmem:[#allocation47_spill] sm:$0xff]  ;;  %v3934_v19 = vld [vmem:[#allocation46_spill] sm:$0xff]  ;;  %s2850_s13 = smov 32   ;;  %vm750_vm7 = vcmask 523264   ;;  %s2851_s23 = smov 64  }
 0x28d   : > { %v3932_v21 = vld [vmem:[#allocation48_spill] sm:$0xff]  ;;  %v3935_v18 = vld [vmem:[#allocation45_spill] sm:$0xff]  ;;  %v3937_v16 = vld [vmem:[#allocation43_spill] sm:$0xff]  ;;  %vm958_vm0 = vcmask 97280   ;;  %s549_s22 = sadd.s32 1, %s2830_s22  }
 0x28e   : > { %v3936_v17 = vld [vmem:[#allocation44_spill] sm:$0xff]  ;;  %v3938_v15 = vld [vmem:[#allocation42_spill] sm:$0xff]  ;;  %v3939_v14 = vld [vmem:[#allocation41_spill] sm:$0xff]  ;;  %p3717_p0 = scmp.ge.s32.totalorder %s549_s22, 4  }
 0x28f   : > { %v3940_v13 = vld [vmem:[#allocation40_spill] sm:$0xff]  ;;  %v3941_v12 = vld [vmem:[#allocation39_spill] sm:$0xff]  ;;  %v3942_v11 = vld [vmem:[#allocation38_spill] sm:$0xff]  ;;  %2160 = vmatpush.msra.mxu3 %v3936_v17  ;;  %638 = vmatpush.msra.mxu1 %v3936_v17  ;;  %s3980_s15 = sld [smem:[#allocation71_spill]] (%p3717_p0) }
 0x290   : > { %v3943_v10 = vld [vmem:[#allocation37_spill] sm:$0xff]  ;;  %2156 = vmatpush.msra.mxu2 %v3940_v13  ;;  %590 = vmatpush.msra.mxu0 %v3940_v13  ;;  %v3944_v29 = vld [vmem:[#allocation56_spill] sm:$0xff]  ;;  %v3946_v23 = vld [vmem:[#allocation50_spill] sm:$0xff]  ;;  %s3981_s12 = sld [smem:[#allocation79_spill]] (%p3717_p0) }
 0x291   : > { %2161 = vmatpush.msra.mxu3 %v3937_v16  ;;  %639 = vmatpush.msra.mxu1 %v3937_v16  ;;  %v3945_v22 = vld [vmem:[#allocation49_spill] sm:$0xff]  ;;  %v3947_v6 = vld [vmem:[#allocation34_spill] sm:$0xff]  ;;  %v3948_v7 = vld [vmem:[#allocation35_spill] sm:$0xff] }
 0x292   : > { %2157 = vmatpush.msra.mxu2 %v3941_v12  ;;  %591 = vmatpush.msra.mxu0 %v3941_v12  ;;  %v3367_v24 = vperm.slane %v3945_v22, 0  ;;  %v3949_v8 = vld [vmem:[#allocation36_spill] sm:$0xff] }
 0x293   : > { %2162 = vmatpush.msra.mxu3 %v3938_v15  ;;  %640 = vmatpush.msra.mxu1 %v3938_v15 }
 0x294   : > { %2158 = vmatpush.msra.mxu2 %v3942_v11  ;;  %592 = vmatpush.msra.mxu0 %v3942_v11 }
 0x295   : > { %2163 = vmatpush.msra.mxu3 %v3939_v14  ;;  %641 = vmatpush.msra.mxu1 %v3939_v14 }
 0x296   : > { %2159 = vmatpush.msra.mxu2 %v3943_v10  ;;  %593 = vmatpush.msra.mxu0 %v3943_v10 }
 0x297   : > { %2070 = vmatmul.msk.f32.vlgmr.msra.gmra.mxu2 %vm565_vm4, %v2818_v60  ;;  %2068 = vmatmul.msk.f32.vlgmr.msra.gmra.mxu0 %vm565_vm4, %v2826_v48 }
 0x298   : > { %726 = vmatpush.msrb.mxu3 %v3932_v21  ;;  %913 = vmatpush.msrb.mxu0 %v3165_v32 }
 0x299   : > { %947 = vmatpush.msrb.mxu1 %v3173_v36 }
 0x29a   : > { %727 = vmatpush.msrb.mxu3 %v3933_v20  ;;  %914 = vmatpush.msrb.mxu0 %v3163_v31 }
 0x29b   : > { %948 = vmatpush.msrb.mxu1 %v3171_v35 }
 0x29c   : > { %728 = vmatpush.msrb.mxu3 %v3934_v19  ;;  %915 = vmatpush.msrb.mxu0 %v3161_v30 }
 0x29d   : > { %949 = vmatpush.msrb.mxu1 %v3169_v34 }
 0x29e   : > { %729 = vmatpush.msrb.mxu3 %v3935_v18  ;;  %916 = vmatpush.msrb.mxu0 %v3944_v29 }
 0x29f   : > { %2071 = vmatmul.msk.f32.gmra.mxu2 %vm565_vm4, %v2814_v50  ;;  %2069 = vmatmul.msk.f32.gmra.mxu0 %vm565_vm4, %v2822_v59 }
 0x2a0   : > { %950 = vmatpush.msrb.mxu1 %v3167_v33  ;;  %1243 = vmatpush.msra.mxu0 %v3940_v13 }
 0x2a2   : > { %1244 = vmatpush.msra.mxu0 %v3941_v12 }
 0x2a4   : > { %1245 = vmatpush.msra.mxu0 %v3942_v11 }
 0x2a6   : > { %1246 = vmatpush.msra.mxu0 %v3943_v10 }
 0x314   : > { %v595_v49 = vpop.f32.mrf.mxu0 }
 0x315   : > { %v596_v38 = vadd.f32 %v595_v49, %v3367_v24 }
 0x317   : > { %v607_v0 = vmax.f32 %v596_v38, 0.0 }
 0x319   : > { %2072 = vmatmul.msk.f32.vlgmr.msra.gmra.mxu1 %vm565_vm4, %v607_v0 }
 0x31a   : > { %v601_v61 = vpop.f32.mrf.mxu2  ;;  %1288 = vmatpush.msra.mxu1 %v3936_v17 }
 0x31b   : > { %v602_v62 = vadd.f32 %v601_v61, %v3367_v24 }
 0x31c   : > { %v598_v63 = vpop.f32.mrf.mxu0  ;;  %1289 = vmatpush.msra.mxu1 %v3937_v16 }
 0x31d   : > { %v609_v3 = vmax.f32 %v602_v62, 0.0  ;;  %v599_v10 = vadd.f32 %v598_v63, %v3367_v24  ;;  %v3386_v62 = vperm.slane %v3946_v23, 0 }
 0x31e   : > { %1290 = vmatpush.msra.mxu1 %v3938_v15 }
 0x31f   : > { %2074 = vmatmul.msk.f32.vlgmr.msra.gmra.mxu3 %vm565_vm4, %v609_v3  ;;  %v608_v11 = vmax.f32 %v599_v10, 0.0 }
 0x320   : > { %879 = vmatpush.msra.mxu3 %v3928_v28  ;;  %1291 = vmatpush.msra.mxu1 %v3939_v14 }
 0x321   : > { %2073 = vmatmul.msk.f32.gmra.mxu1 %vm565_vm4, %v608_v11 }
 0x322   : > { %v604_v49 = vpop.f32.mrf.mxu2  ;;  %880 = vmatpush.msra.mxu3 %v3929_v27 }
 0x323   : > { %v605_v38 = vadd.f32 %v604_v49, %v3367_v24 }
 0x324   : > { %881 = vmatpush.msra.mxu3 %v3930_v26 }
 0x325   : > { %v610_v0 = vmax.f32 %v605_v38, 0.0 }
 0x326   : > { %882 = vmatpush.msra.mxu3 %v3931_v25 }
 0x327   : > { %2075 = vmatmul.msk.f32.gmra.mxu3 %vm565_vm4, %v610_v0 }
 0x396   : > { %v643_v61 = vpop.f32.mrf.mxu1 }
 0x397   : > { %v644_v14 = vadd.f32 %v643_v61, %v3386_v62 }
 0x399   : > { %v655_v0 = vmax.f32 %v644_v14, 0.0 }
 0x39e   : > { %v646_v63 = vpop.f32.mrf.mxu1 }
 0x39f   : > { %v647_v49 = vadd.f32 %v646_v63, %v3386_v62  ;;  %v3954_v63 = vld [vmem:[#allocation51_spill] sm:$0xff] }
 0x3a1   : > { %v656_v15 = vmax.f32 %v647_v49, 0.0 }
 0x3a2   : > { %v649_v10 = vpop.f32.mrf.mxu3 }
 0x3a3   : > { %v650_v11 = vadd.f32 %v649_v10, %v3386_v62 }
 0x3a5   : > { %v657_v38 = vmax.f32 %v650_v11, 0.0 }
 0x3aa   : > { %v652_v3 = vpop.f32.mrf.mxu3 }
 0x3ab   : > { %v653_v12 = vadd.f32 %v652_v3, %v3386_v62  ;;  %v704_v3 = vperm.slane %v3954_v63, 0 }
 0x3ad   : > { %v658_v13 = vmax.f32 %v653_v12, 0.0  ;;  %v2849_v12 = vmov 0  }
 0x3ae   : > { %2301 = vset.pattern.permute.xlu0 %v2849_v12  ;;  %2302 = vset.pattern.permute.xlu1 %v2849_v12 }
 0x3af   : > { %2076 = vmatpush.msk.msrb.mxu2 %vm666_vm5, %v658_v13  ;;  %695 = vperm.xlu0 %2301, %v3948_v7  }
 0x3b0   : > { %700 = vperm.xlu1 %2302, %v3949_v8  }
 0x3b1   : > { %683 = vmatpush.msrb.mxu2 %v657_v38 }
 0x3b3   : > { %684 = vmatpush.msrb.mxu2 %v656_v15 }
 0x3b5   : > { %685 = vmatpush.msrb.mxu2 %v655_v0 }
 0x3b6   : > { %2077 = vmatmul.msk.f32.vlgmr.msrb.gmra.mxu2 %vm659_vm6, %v3069_v5 }
 0x3b7   : > { %765 = vmatpush.msra.mxu2 %v3204_v47  ;;  %739 = vrot.lane.b32.xlu0 %v2810_v9, %s2850_s13  ;;  %v3950_v9 = vld [vmem:[#allocation62_spill] sm:$0xff] }
 0x3b8   : > { %741 = vrot.lane.b32.xlu1 %v2806_v58, %s2850_s13  ;;  %v3951_v15 = vmov %v3950_v9  ;;  %v3952_v58 = vld [vmem:[#allocation61_spill] sm:$0xff] }
 0x3b9   : > { %766 = vmatpush.msra.mxu2 %v3202_v46  ;;  %v3953_v61 = vmov %v3952_v58 }
 0x3bb   : > { %767 = vmatpush.msra.mxu2 %v3200_v45 }
 0x3bd   : > { %768 = vmatpush.msra.mxu2 %v3198_v44 }
 0x3be   : > { %2078 = vmatmul.msk.f32.gmra.mxu2 %vm659_vm6, %v3947_v6 }
 0x3bf   : > { %769 = vmatpush.msra.mxu2 %v3196_v43 }
 0x3c1   : > { %770 = vmatpush.msra.mxu2 %v3194_v42 }
 0x3c3   : > { %771 = vmatpush.msra.mxu2 %v3192_v41 }
 0x3c5   : > { %772 = vmatpush.msra.mxu2 %v3190_v40 }
 0x421   : > { %v696_v10 = vpop.permute.xlu0 %695 }
 0x422   : > { %v701_v11 = vpop.permute.xlu1 %700  ;;  %v3422_v49 = vmul.f32 %v704_v3, %v696_v10  ;;  %v3957_v10 = vld [vmem:[#allocation60_spill] sm:$0xff] }
 0x423   : > { %v3433_v8 = vperm.slane %v3957_v10, 0 }
 0x424   : > { %3955 = vst [vmem:[#allocation64_spill] sm:$0xff] %v3422_v49 }
 0x425   : > { %3958 = vst [vmem:[#allocation66_spill] sm:$0xff] %v3433_v8 }
 0x429   : > { %v740_v0 = vpop.permute.xlu0 %739 }
 0x42a   : > { %v742_v7 = vpop.permute.xlu1 %741 }
 0x439   : > { %v687_v13 = vpop.f32.mrf.mxu2 }
 0x43a   : > { %2079 = vmatmul.msk.f32.vlgmr.msrb.gmra.mxu3 %vm565_vm4, %v687_v13 }
 0x43b   : > { %1042 = vmatpush.msrb.mxu3 %v3225_v56 }
 0x43d   : > { %1043 = vmatpush.msrb.mxu3 %v3223_v55 }
 0x43f   : > { %1044 = vmatpush.msrb.mxu3 %v3221_v54 }
 0x441   : > { %v690_v14 = vpop.f32.mrf.mxu2  ;;  %1045 = vmatpush.msrb.mxu3 %v3219_v53 }
 0x442   : > { %2080 = vmatmul.msk.f32.gmra.mxu3 %vm565_vm4, %v690_v14  ;;  %v3427_v14 = vmul.f32 %v704_v3, %v701_v11 }
 0x443   : > { %1046 = vmatpush.msrb.mxu3 %v3217_v52 }
 0x444   : > { %3956 = vst [vmem:[#allocation65_spill] sm:$0xff] %v3427_v14 }
 0x445   : > { %1047 = vmatpush.msrb.mxu3 %v3215_v51 }
 0x447   : > { %1048 = vmatpush.msrb.mxu3 %v3950_v9 }
 0x449   : > { %1049 = vmatpush.msrb.mxu3 %v3952_v58 }
 0x4bd   : > { %v731_v38 = vpop.f32.mrf.mxu3 }
 0x4be   : > { %v732_v12 = vadd.f32 %v731_v38, %v3422_v49 }
 0x4c0   : > { %v745_v13 = vsel %vm565_vm4, %v732_v12, %v740_v0 }
 0x4c1   : > { %2081 = vmatmul.msk.f32.vlgmr.msra.gmra.mxu2 %vm750_vm7, %v745_v13 }
 0x4c5   : > { %v734_v9 = vpop.f32.mrf.mxu3 }
 0x4c6   : > { %v735_v58 = vadd.f32 %v734_v9, %v3427_v14 }
 0x4c8   : > { %v746_v63 = vsel %vm565_vm4, %v735_v58, %v742_v7 }
 0x4c9   : > { %2082 = vmatmul.msk.f32.gmra.mxu2 %vm750_vm7, %v746_v63 }
 0x544   : > { %v774_v16 = vpop.f32.mrf.mxu2 }
 0x545   : > { %v775_v38 = vadd.f32 %v774_v16, %v3433_v8 }
 0x547   : > { %2303 = vtanh.f32 %v775_v38  ;;  %v2083_v7 = vmul.f32 -1.442695, %v775_v38 }
 0x54c   : > { %v777_v0 = vpop.f32.mrf.mxu2 }
 0x54d   : > { %v2304_v12 = vpop.eup %2303  ;;  %v778_v3 = vadd.f32 %v777_v0, %v3433_v8 }
 0x54e   : > { %824 = vrot.lane.b32.xlu2 %v2304_v12, %s2851_s23 }
 0x54f   : > { %2305 = vtanh.f32 %v778_v3  ;;  %v2084_v13 = vmul.f32 -1.442695, %v778_v3 }
 0x550   : > { %2307 = vpow2.f32 %v2083_v7 }
 0x551   : > { %2309 = vpow2.f32 %v2084_v13 }
 0x555   : > { %v2306_v11 = vpop.eup %2305 }
 0x556   : > { %826 = vrot.lane.b32.xlu2 %v2306_v11, %s2851_s23  ;;  %v2308_v9 = vpop.eup %2307 }
 0x557   : > { %v786_v58 = vadd.f32 1.0, %v2308_v9  ;;  %v2310_v16 = vpop.eup %2309 }
 0x558   : > { %v787_v63 = vadd.f32 1.0, %v2310_v16 }
 0x559   : > { %2311 = vrcp.f32 %v786_v58  ;;  %v799_v11 = vand.u32 2147483648, %v786_v58  ;;  %vm793_vm9 = vweird.f32 %v786_v58  ;;  %v797_v38 = vand.u32 2147483647, %v786_v58 }
 0x55a   : > { %2313 = vrcp.f32 %v787_v63  ;;  %vm808_vm13 = vweird.f32 %v787_v63 }
 0x55b   : > { %v800_v13 = vor.u32 1.1754944e-38, %v799_v11  ;;  %vm798_vm11 = vcmp.eq.f32.partialorder %v797_v38, 8.507059e+37 }
 0x55f   : > { %v2312_v10 = vpop.eup %2311 }
 0x560   : > { %v789_v17 = vmul.f32 %v2312_v10, %v786_v58  ;;  %v2314_v22 = vpop.eup %2313  ;;  %vm794_vm8 = vweird.f32 %v2312_v10 }
 0x561   : > { %v804_v12 = vmul.f32 %v2314_v22, %v787_v63  ;;  %vm795_vm10 = vmor %vm793_vm9, %vm794_vm8  ;;  %vm809_vm12 = vweird.f32 %v2314_v22 }
 0x562   : > { %v790_v0 = vsub.f32 1.0, %v789_v17  ;;  %v814_v17 = vand.u32 2147483648, %v787_v63  ;;  %vm810_vm14 = vmor %vm808_vm13, %vm809_vm12 }
 0x563   : > { %v805_v14 = vsub.f32 1.0, %v804_v12 }
 0x564   : > { %v791_v23 = vmul.f32 %v2312_v10, %v790_v0  ;;  %v815_v12 = vor.u32 1.1754944e-38, %v814_v17 }
 0x565   : > { %v806_v7 = vmul.f32 %v2314_v22, %v805_v14 }
 0x566   : > { %v792_v8 = vadd.f32 %v2312_v10, %v791_v23  ;;  %v812_v23 = vand.u32 2147483647, %v787_v63 }
 0x567   : > { %v807_v6 = vadd.f32 %v2314_v22, %v806_v7 }
 0x568   : > { %v796_v3 = vsel %vm795_vm10, %v2312_v10, %v792_v8  ;;  %vm813_vm15 = vcmp.eq.f32.partialorder %v812_v23, 8.507059e+37 }
 0x569   : > { %v801_v16 = vsel %vm798_vm11, %v800_v13, %v796_v3  ;;  %v811_v0 = vsel %vm810_vm14, %v2314_v22, %v807_v6 }
 0x56a   : > { %v816_v29 = vsel %vm813_vm15, %v815_v12, %v811_v0  ;;  %v820_v14 = vmul.f32 %v2786_v57, %v801_v16  ;;  %v3960_v0 = vld [vmem:[#allocation58_spill] sm:$0xff] }
 0x56b   : > { %v3489_v12 = vperm.slane %v3960_v0, 0 }
 0x5a8   : > { %v825_v9 = vpop.permute.xlu2 %824 }
 0x5a9   : > { %v830_v49 = vmul.f32 %v825_v9, %v801_v16 }
 0x5ab   : > { %834 = vrot.lane.b32.xlu0 %v830_v49, %s2850_s13  ;;  %v821_v49 = vmul.f32 %v2782_v4, %v816_v29 }
 0x5b0   : > { %v827_v58 = vpop.permute.xlu2 %826 }
 0x5b1   : > { %v831_v8 = vmul.f32 %v827_v58, %v816_v29 }
 0x5b3   : > { %836 = vrot.lane.b32.xlu1 %v831_v8, %s2850_s13 }
 0x61d   : > { %v835_v10 = vpop.permute.xlu0 %834 }
 0x61e   : > { %v3442_v11 = vadd.f32 %v835_v10, %v820_v14 }
 0x620   : > { %2315 = vtanh.f32 %v3442_v11 }
 0x625   : > { %v837_v38 = vpop.permute.xlu1 %836 }
 0x626   : > { %v2316_v63 = vpop.eup %2315  ;;  %v3446_v3 = vadd.f32 %v837_v38, %v821_v49 }
 0x627   : > { %846 = vrot.lane.b32.xlu2 %v2316_v63, %s2851_s23 }
 0x628   : > { %2317 = vtanh.f32 %v3446_v3 }
 0x62e   : > { %v2318_v6 = vpop.eup %2317 }
 0x62f   : > { %848 = vrot.lane.b32.xlu0 %v2318_v6, %s2851_s23  ;;  %v3961_v6 = vld [vmem:[#allocation59_spill] sm:$0xff] }
 0x637   : > { %1003 = vrot.lane.b32.xlu0 %v2826_v48, %s2850_s13 }
 0x63f   : > { %1009 = vrot.lane.b32.xlu0 %v2814_v50, %s2850_s13 }
 0x681   : > { %v847_v22 = vpop.permute.xlu2 %846 }
 0x682   : > { %v3455_v57 = vmul.f32 %v847_v22, %v801_v16  ;;  %v3500_v22 = vperm.slane %v3961_v6, 0 }
 0x684   : > { %859 = vrot.lane.b32.xlu1 %v3455_v57, %s2850_s13 }
 0x68c   : > { %1005 = vrot.lane.b32.xlu1 %v2822_v59, %s2850_s13 }
 0x6a1   : > { %v849_v4 = vpop.permute.xlu0 %848 }
 0x6a2   : > { %v3461_v7 = vmul.f32 %v849_v4, %v816_v29  ;;  %v3959_v29 = vld [vmem:[#allocation57_spill] sm:$0xff] }
 0x6a3   : > { %v3474_v59 = vperm.slane %v3959_v29, 0  ;;  %v3962_v29 = vld [vmem:[#allocation30_spill] sm:$0xff] }
 0x6a4   : > { %861 = vrot.lane.b32.xlu2 %v3461_v7, %s2850_s13 }
 0x6ac   : > { %1007 = vrot.lane.b32.xlu2 %v2818_v60, %s2850_s13 }
 0x6f6   : > { %v860_v48 = vpop.permute.xlu1 %859 }
 0x6f7   : > { %2085 = vmatmul.msk.f32.vlgmr.msra.gmra.mxu3 %vm565_vm4, %v860_v48 }
 0x6f8   : > { %1353 = vmatpush.msra.mxu3 %v3932_v21 }
 0x6fa   : > { %1354 = vmatpush.msra.mxu3 %v3933_v20 }
 0x6fc   : > { %1355 = vmatpush.msra.mxu3 %v3934_v19 }
 0x6fe   : > { %v862_v50 = vpop.permute.xlu2 %861  ;;  %1356 = vmatpush.msra.mxu3 %v3935_v18 }
 0x6ff   : > { %2086 = vmatmul.msk.f32.gmra.mxu3 %vm565_vm4, %v862_v50 }
 0x77a   : > { %v884_v13 = vpop.f32.mrf.mxu3 }
 0x77b   : > { %v885_v60 = vadd.f32 %v884_v13, %v3474_v59  ;;  %v3963_v13 = vld [vmem:[#allocation31_spill] sm:$0xff] }
 0x77d   : > { %v890_v9 = vmax.f32 %v885_v60, 0.0  ;;  %v3964_v60 = vld [vmem:[#allocation32_spill] sm:$0xff] }
 0x77f   : > { %2087 = vmatmul.msk.f32.vlgmr.msrb.gmra.mxu0 %vm565_vm4, %v890_v9  ;;  %v3966_v9 = vld [vmem:[#allocation33_spill] sm:$0xff] }
 0x780   : > { %1386 = vmatpush.msrb.mxu0 %v3204_v47 }
 0x782   : > { %v887_v16 = vpop.f32.mrf.mxu3  ;;  %1387 = vmatpush.msrb.mxu0 %v3202_v46 }
 0x783   : > { %v888_v17 = vadd.f32 %v887_v16, %v3474_v59  ;;  %v3965_v16 = vmov %v3964_v60 }
 0x784   : > { %1388 = vmatpush.msrb.mxu0 %v3200_v45 }
 0x785   : > { %v891_v23 = vmax.f32 %v888_v17, 0.0  ;;  %v3967_v17 = vmov %v3966_v9 }
 0x786   : > { %1389 = vmatpush.msrb.mxu0 %v3198_v44 }
 0x787   : > { %2088 = vmatmul.msk.f32.gmra.mxu0 %vm565_vm4, %v891_v23  ;;  %v1004_v23 = vpop.permute.xlu0 %1003 }
 0x788   : > { %1390 = vmatpush.msrb.mxu0 %v3196_v43 }
 0x78a   : > { %1391 = vmatpush.msrb.mxu0 %v3194_v42 }
 0x78c   : > { %1392 = vmatpush.msrb.mxu0 %v3192_v41 }
 0x78e   : > { %1393 = vmatpush.msrb.mxu0 %v3190_v40 }
 0x78f   : > { %v1010_v6 = vpop.permute.xlu0 %1009 }
 0x7fc   : > { %v918_v58 = vpop.f32.mrf.mxu0 }
 0x7fd   : > { %v919_v8 = vadd.f32 %v918_v58, %v3489_v12 }
 0x7ff   : > { %v924_v14 = vmax.f32 %v919_v8, 0.0  ;;  %v1006_v8 = vpop.permute.xlu1 %1005 }
 0x801   : > { %2089 = vmatmul.msk.f32.vlgmr.msrb.gmra.mxu1 %vm565_vm4, %v924_v14 }
 0x802   : > { %1497 = vmatpush.msrb.mxu1 %v3928_v28 }
 0x804   : > { %v921_v10 = vpop.f32.mrf.mxu0  ;;  %1498 = vmatpush.msrb.mxu1 %v3929_v27 }
 0x805   : > { %v922_v49 = vadd.f32 %v921_v10, %v3489_v12 }
 0x806   : > { %1499 = vmatpush.msrb.mxu1 %v3930_v26 }
 0x807   : > { %v925_v38 = vmax.f32 %v922_v49, 0.0  ;;  %v1008_v49 = vpop.permute.xlu2 %1007 }
 0x808   : > { %1500 = vmatpush.msrb.mxu1 %v3931_v25 }
 0x809   : > { %2090 = vmatmul.msk.f32.gmra.mxu1 %vm565_vm4, %v925_v38 }
 0x87e   : > { %v952_v63 = vpop.f32.mrf.mxu1 }
 0x87f   : > { %v953_v50 = vadd.f32 %v952_v63, %v3500_v22 }
 0x886   : > { %v955_v4 = vpop.f32.mrf.mxu1 }
 0x887   : > { %v956_v48 = vadd.f32 %v955_v4, %v3500_v22 }
 0x889   : > { %2091 = vmatpush.msk.msrb.mxu2 %vm357_vm1, %v956_v48 }
 0x88b   : > { %989 = vmatpush.msrb.mxu2 %v953_v50  ;;  %v3968_v50 = vld [vmem:[#allocation63_spill] sm:$0xff] }
 0x88c   : > { %2092 = vmatmul.msk.f32.vlgmr.msrb.gmra.mxu2 %vm958_vm0, %v3962_v29 }
 0x894   : > { %2093 = vmatmul.msk.f32.gmra.mxu2 %vm958_vm0, %v3963_v13 }
 0x89c   : > { %2094 = vmatmul.msk.f32.gmra.mxu2 %vm958_vm0, %v3964_v60  ;;  %v3526_v60 = vperm.slane %v3968_v50, 0 }
 0x8a4   : > { %2095 = vmatmul.msk.f32.gmra.mxu2 %vm958_vm0, %v3966_v9 }
 0x90f   : > { %v991_v0 = vpop.f32.mrf.mxu2 }
 0x910   : > { %v1015_v58 = vsel %vm565_vm4, %v991_v0, %v1004_v23 }
 0x911   : > { %2096 = vmatmul.msk.f32.vlgmr.msrb.gmra.mxu3 %vm750_vm7, %v1015_v58 }
 0x912   : > { %1559 = vmatpush.msrb.mxu3 %v3173_v36 }
 0x914   : > { %1560 = vmatpush.msrb.mxu3 %v3171_v35 }
 0x916   : > { %1561 = vmatpush.msrb.mxu3 %v3169_v34 }
 0x917   : > { %v994_v14 = vpop.f32.mrf.mxu2 }
 0x918   : > { %v1016_v10 = vsel %vm565_vm4, %v994_v14, %v1006_v8  ;;  %1562 = vmatpush.msrb.mxu3 %v3167_v33  ;;  %v2399_v33 = vld [vmem:[%s3832_s20] ss:$0 sm:$0xff] (%p3717_p0) }
 0x919   : > { %2097 = vmatmul.msk.f32.gmra.mxu3 %vm750_vm7, %v1016_v10 }
 0x91f   : > { %v997_v38 = vpop.f32.mrf.mxu2 }
 0x920   : > { %v1017_v63 = vsel %vm565_vm4, %v997_v38, %v1008_v49 }
 0x921   : > { %2098 = vmatmul.msk.f32.gmra.mxu3 %vm750_vm7, %v1017_v63 }
 0x927   : > { %v1000_v4 = vpop.f32.mrf.mxu2 }
 0x928   : > { %v1018_v48 = vsel %vm565_vm4, %v1000_v4, %v1010_v6 }
 0x929   : > { %2099 = vmatmul.msk.f32.gmra.mxu3 %vm750_vm7, %v1018_v48 }
 0x994   : > { %v1051_v9 = vpop.f32.mrf.mxu3 }
 0x995   : > { %v1052_v23 = vadd.f32 %v1051_v9, %v3526_v60 }
 0x997   : > { %2319 = vtanh.f32 %v1052_v23 }
 0x99c   : > { %v1054_v0 = vpop.f32.mrf.mxu3 }
 0x99d   : > { %v2320_v58 = vpop.eup %2319  ;;  %v1055_v8 = vadd.f32 %v1054_v0, %v3526_v60  ;;  %v2100_v0 = vmul.f32 -1.442695, %v1052_v23 }
 0x99e   : > { %1151 = vrot.lane.b32.xlu1 %v2320_v58, %s2851_s23 }
 0x99f   : > { %2321 = vtanh.f32 %v1055_v8  ;;  %v2101_v48 = vmul.f32 -1.442695, %v1055_v8 }
 0x9a4   : > { %v1057_v14 = vpop.f32.mrf.mxu3 }
 0x9a5   : > { %v2322_v10 = vpop.eup %2321  ;;  %v1058_v49 = vadd.f32 %v1057_v14, %v3526_v60 }
 0x9a6   : > { %1153 = vrot.lane.b32.xlu2 %v2322_v10, %s2851_s23 }
 0x9a7   : > { %2323 = vtanh.f32 %v1058_v49  ;;  %v2102_v20 = vmul.f32 -1.442695, %v1058_v49 }
 0x9ac   : > { %v1060_v38 = vpop.f32.mrf.mxu3 }
 0x9ad   : > { %v2324_v63 = vpop.eup %2323  ;;  %v1061_v6 = vadd.f32 %v1060_v38, %v3526_v60 }
 0x9ae   : > { %1155 = vrot.lane.b32.xlu0 %v2324_v63, %s2851_s23 }
 0x9af   : > { %2325 = vtanh.f32 %v1061_v6  ;;  %v2103_v8 = vmul.f32 -1.442695, %v1061_v6 }
 0x9b0   : > { %2327 = vpow2.f32 %v2101_v48 }
 0x9b5   : > { %v2326_v4 = vpop.eup %2325 }
 0x9b6   : > { %1157 = vrot.lane.b32.xlu1 %v2326_v4, %s2851_s23  ;;  %v2328_v50 = vpop.eup %2327 }
 0x9b7   : > { %v1076_v9 = vadd.f32 1.0, %v2328_v50 }
 0x9b9   : > { %2329 = vrcp.f32 %v1076_v9  ;;  %v1105_v4 = vand.u32 2147483648, %v1076_v9  ;;  %vm1099_vm3 = vweird.f32 %v1076_v9  ;;  %v1103_v48 = vand.u32 2147483647, %v1076_v9 }
 0x9ba   : > { %2331 = vpow2.f32 %v2100_v0 }
 0x9bb   : > { %v1106_v25 = vor.u32 1.1754944e-38, %v1105_v4  ;;  %vm1104_vm9 = vcmp.eq.f32.partialorder %v1103_v48, 8.507059e+37 }
 0x9bf   : > { %v2330_v58 = vpop.eup %2329 }
 0x9c0   : > { %v2332_v14 = vpop.eup %2331  ;;  %v1095_v10 = vmul.f32 %v2330_v58, %v1076_v9  ;;  %vm1100_vm2 = vweird.f32 %v2330_v58 }
 0x9c1   : > { %v1075_v18 = vadd.f32 1.0, %v2332_v14  ;;  %vm1101_vm8 = vmor %vm1099_vm3, %vm1100_vm2 }
 0x9c2   : > { %v1096_v19 = vsub.f32 1.0, %v1095_v10 }
 0x9c3   : > { %2333 = vrcp.f32 %v1075_v18  ;;  %vm1084_vm11 = vweird.f32 %v1075_v18  ;;  %v1088_v4 = vand.u32 2147483647, %v1075_v18 }
 0x9c4   : > { %v1097_v38 = vmul.f32 %v2330_v58, %v1096_v19  ;;  %2335 = vpow2.f32 %v2102_v20 }
 0x9c5   : > { %2337 = vpow2.f32 %v2103_v8  ;;  %vm1089_vm13 = vcmp.eq.f32.partialorder %v1088_v4, 8.507059e+37 }
 0x9c6   : > { %v1098_v63 = vadd.f32 %v2330_v58, %v1097_v38 }
 0x9c8   : > { %v1102_v50 = vsel %vm1101_vm8, %v2330_v58, %v1098_v63  ;;  %v1090_v63 = vand.u32 2147483648, %v1075_v18 }
 0x9c9   : > { %v2334_v21 = vpop.eup %2333  ;;  %v3536_v49 = vsel %vm1104_vm9, %v1106_v25, %v1102_v50 }
 0x9ca   : > { %v2336_v23 = vpop.eup %2335  ;;  %v1080_v0 = vmul.f32 %v2334_v21, %v1075_v18  ;;  %vm1085_vm10 = vweird.f32 %v2334_v21  ;;  %v1091_v48 = vor.u32 1.1754944e-38, %v1090_v63 }
 0x9cb   : > { %v1077_v14 = vadd.f32 1.0, %v2336_v23  ;;  %v2338_v6 = vpop.eup %2337  ;;  %vm1086_vm12 = vmor %vm1084_vm11, %vm1085_vm10 }
 0x9cc   : > { %v1081_v20 = vsub.f32 1.0, %v1080_v0  ;;  %v1078_v9 = vadd.f32 1.0, %v2338_v6 }
 0x9cd   : > { %2339 = vrcp.f32 %v1077_v14  ;;  %v1120_v28 = vand.u32 2147483648, %v1077_v14  ;;  %vm1114_vm15 = vweird.f32 %v1077_v14  ;;  %v1118_v18 = vand.u32 2147483647, %v1077_v14 }
 0x9ce   : > { %v1082_v38 = vmul.f32 %v2334_v21, %v1081_v20  ;;  %2341 = vrcp.f32 %v1078_v9  ;;  %vm1129_vm9 = vweird.f32 %v1078_v9 }
 0x9cf   : > { %v1121_v63 = vor.u32 1.1754944e-38, %v1120_v28  ;;  %vm1119_vm3 = vcmp.eq.f32.partialorder %v1118_v18, 8.507059e+37  ;;  %v1144_v18 = vmul.f32 %v2798_v37, %v3536_v49 }
 0x9d0   : > { %v1083_v26 = vadd.f32 %v2334_v21, %v1082_v38 }
 0x9d2   : > { %v1087_v8 = vsel %vm1086_vm12, %v2334_v21, %v1083_v26 }
 0x9d3   : > { %v2340_v58 = vpop.eup %2339  ;;  %v1092_v50 = vsel %vm1089_vm13, %v1091_v48, %v1087_v8 }
 0x9d4   : > { %v1110_v25 = vmul.f32 %v2340_v58, %v1077_v14  ;;  %vm1115_vm14 = vweird.f32 %v2340_v58 }
 0x9d5   : > { %vm1116_vm2 = vmor %vm1114_vm15, %vm1115_vm14 }
 0xa00   : > { %v1154_v10 = vpop.permute.xlu2 %1153 }
 0xa01   : > { %v1164_v19 = vmul.f32 %v1154_v10, %v3536_v49  ;;  %v1111_v10 = vsub.f32 1.0, %v1110_v25 }
 0xa03   : > { %1173 = vrot.lane.b32.xlu0 %v1164_v19, %s2850_s13  ;;  %v2342_v19 = vpop.eup %2341  ;;  %v1112_v20 = vmul.f32 %v2340_v58, %v1111_v10 }
 0xa04   : > { %v1125_v6 = vmul.f32 %v2342_v19, %v1078_v9  ;;  %vm1130_vm8 = vweird.f32 %v2342_v19 }
 0xa05   : > { %v1113_v38 = vadd.f32 %v2340_v58, %v1112_v20  ;;  %vm1131_vm10 = vmor %vm1129_vm9, %vm1130_vm8 }
 0xa06   : > { %v1126_v27 = vsub.f32 1.0, %v1125_v6 }
 0xa07   : > { %v1117_v21 = vsel %vm1116_vm2, %v2340_v58, %v1113_v38 }
 0xa08   : > { %v1127_v26 = vmul.f32 %v2342_v19, %v1126_v27  ;;  %v1122_v4 = vsel %vm1119_vm3, %v1121_v63, %v1117_v21  ;;  %v1143_v27 = vmul.f32 %v2802_v39, %v1092_v50 }
 0xa09   : > { %v1145_v37 = vmul.f32 %v2794_v2, %v1122_v4 }
 0xa0a   : > { %v1128_v25 = vadd.f32 %v2342_v19, %v1127_v26 }
 0xa0c   : > { %v1132_v10 = vsel %vm1131_vm10, %v2342_v19, %v1128_v25 }
 0xa10   : > { %v1152_v23 = vpop.permute.xlu1 %1151 }
 0xa11   : > { %v1163_v0 = vmul.f32 %v1152_v23, %v1092_v50  ;;  %v1135_v23 = vand.u32 2147483648, %v1078_v9 }
 0xa13   : > { %1171 = vrot.lane.b32.xlu2 %v1163_v0, %s2850_s13  ;;  %v1133_v0 = vand.u32 2147483647, %v1078_v9  ;;  %v1136_v20 = vor.u32 1.1754944e-38, %v1135_v23 }
 0xa15   : > { %vm1134_vm11 = vcmp.eq.f32.partialorder %v1133_v0, 8.507059e+37 }
 0xa16   : > { %v1137_v6 = vsel %vm1134_vm11, %v1136_v20, %v1132_v10 }
 0xa17   : > { %v1146_v39 = vmul.f32 %v2790_v1, %v1137_v6 }
 0xa20   : > { %v1156_v8 = vpop.permute.xlu0 %1155 }
 0xa21   : > { %v1165_v48 = vmul.f32 %v1156_v8, %v1122_v4 }
 0xa23   : > { %1175 = vrot.lane.b32.xlu1 %v1165_v48, %s2850_s13 }
 0xa28   : > { %v1158_v14 = vpop.permute.xlu1 %1157 }
 0xa29   : > { %v1166_v58 = vmul.f32 %v1158_v14, %v1137_v6 }
 0xa2b   : > { %1177 = vrot.lane.b32.xlu2 %v1166_v58, %s2850_s13 }
 0xa6d   : > { %v1172_v28 = vpop.permute.xlu2 %1171 }
 0xa6e   : > { %v3544_v38 = vadd.f32 %v1172_v28, %v1143_v27 }
 0xa70   : > { %2343 = vtanh.f32 %v3544_v38 }
 0xa75   : > { %v1174_v9 = vpop.permute.xlu0 %1173 }
 0xa76   : > { %v2344_v21 = vpop.eup %2343  ;;  %v3549_v19 = vadd.f32 %v1174_v9, %v1144_v18 }
 0xa77   : > { %1195 = vrot.lane.b32.xlu0 %v2344_v21, %s2851_s23 }
 0xa78   : > { %2345 = vtanh.f32 %v3549_v19 }
 0xa7e   : > { %v2346_v26 = vpop.eup %2345 }
 0xa7f   : > { %1197 = vrot.lane.b32.xlu1 %v2346_v26, %s2851_s23 }
 0xa85   : > { %v1178_v63 = vpop.permute.xlu2 %1177 }
 0xa86   : > { %v3555_v8 = vadd.f32 %v1178_v63, %v1146_v39 }
 0xa88   : > { %2347 = vtanh.f32 %v3555_v8 }
 0xa8e   : > { %v2348_v48 = vpop.eup %2347 }
 0xa8f   : > { %1201 = vrot.lane.b32.xlu0 %v2348_v48, %s2851_s23 }
 0xa95   : > { %v1176_v25 = vpop.permute.xlu1 %1175 }
 0xa96   : > { %v3560_v23 = vadd.f32 %v1176_v25, %v1145_v37 }
 0xa98   : > { %2349 = vtanh.f32 %v3560_v23 }
 0xa9e   : > { %v2350_v0 = vpop.eup %2349 }
 0xa9f   : > { %1199 = vrot.lane.b32.xlu2 %v2350_v0, %s2851_s23 }
 0xae9   : > { %v1196_v10 = vpop.permute.xlu0 %1195 }
 0xaea   : > { %v3564_v1 = vmul.f32 %v1196_v10, %v1092_v50 }
 0xaec   : > { %1215 = vrot.lane.b32.xlu1 %v3564_v1, %s2850_s13 }
 0xaf1   : > { %v1198_v20 = vpop.permute.xlu1 %1197 }
 0xaf2   : > { %v3569_v14 = vmul.f32 %v1198_v20, %v3536_v49 }
 0xaf4   : > { %1217 = vrot.lane.b32.xlu2 %v3569_v14, %s2850_s13 }
 0xaf9   : > { %v1200_v2 = vpop.permute.xlu2 %1199 }
 0xafa   : > { %v3573_v58 = vmul.f32 %v1200_v2, %v1122_v4 }
 0xafc   : > { %1219 = vrot.lane.b32.xlu0 %v3573_v58, %s2850_s13  ;;  %1364 = vrot.lane.b32.xlu2 %v3455_v57, %s2851_s23 }
 0xb01   : > { %v1202_v50 = vpop.permute.xlu0 %1201 }
 0xb02   : > { %v3579_v27 = vmul.f32 %v1202_v50, %v1137_v6 }
 0xb04   : > { %1366 = vrot.lane.b32.xlu0 %v3461_v7, %s2851_s23  ;;  %1221 = vrot.lane.b32.xlu1 %v3579_v27, %s2850_s13 }
 0xb4e   : > { %v1218_v4 = vpop.permute.xlu2 %1217 }
 0xb5e   : > { %v1216_v49 = vpop.permute.xlu1 %1215 }
 0xb5f   : > { %2104 = vmatmul.msk.f32.vlgmr.msra.gmra.mxu0 %vm565_vm4, %v1216_v49 }
 0xb67   : > { %2105 = vmatmul.msk.f32.gmra.mxu0 %vm565_vm4, %v1218_v4 }
 0xb6e   : > { %v1220_v28 = vpop.permute.xlu0 %1219 }
 0xb6f   : > { %2106 = vmatmul.msk.f32.gmra.mxu0 %vm565_vm4, %v1220_v28 }
 0xb76   : > { %v1222_v18 = vpop.permute.xlu1 %1221 }
 0xb77   : > { %2107 = vmatmul.msk.f32.gmra.mxu0 %vm565_vm4, %v1222_v18 }
 0xbdc   : > { %v1248_v57 = vpop.f32.mrf.mxu0 }
 0xbdd   : > { %v1249_v6 = vadd.f32 %v1248_v57, %v3367_v24 }
 0xbdf   : > { %v1260_v9 = vmax.f32 %v1249_v6, 0.0 }
 0xbe1   : > { %2108 = vmatmul.msk.f32.vlgmr.msra.gmra.mxu1 %vm565_vm4, %v1260_v9 }
 0xbe2   : > { %1638 = vmatpush.msra.mxu1 %v3225_v56 }
 0xbe4   : > { %v1251_v7 = vpop.f32.mrf.mxu0  ;;  %1639 = vmatpush.msra.mxu1 %v3223_v55  ;;  %v1963_v55 = vld [vmem:[%s3833_s21] sm:$0xff] (%p3717_p0) }
 0xbe5   : > { %v1252_v21 = vadd.f32 %v1251_v7, %v3367_v24  ;;  %v3969_v7 = vld [vmem:[#allocation56_spill] sm:$0xff] }
 0xbe6   : > { %1640 = vmatpush.msra.mxu1 %v3221_v54  ;;  %v1964_v54 = vld [vmem:[%s3833_s21 + $0x8] sm:$0xff] (%p3717_p0) }
 0xbe7   : > { %v1261_v26 = vmax.f32 %v1252_v21, 0.0 }
 0xbe8   : > { %1641 = vmatpush.msra.mxu1 %v3219_v53  ;;  %v1965_v53 = vld [vmem:[%s3833_s21 + $0x10] sm:$0xff] (%p3717_p0) }
 0xbe9   : > { %2109 = vmatmul.msk.f32.gmra.mxu1 %vm565_vm4, %v1261_v26 }
 0xbea   : > { %1642 = vmatpush.msra.mxu1 %v3217_v52  ;;  %v1966_v52 = vld [vmem:[%s3833_s21 + $0x18] sm:$0xff] (%p3717_p0) }
 0xbec   : > { %v1254_v39 = vpop.f32.mrf.mxu0  ;;  %1643 = vmatpush.msra.mxu1 %v3215_v51 }
 0xbed   : > { %v1255_v63 = vadd.f32 %v1254_v39, %v3367_v24 }
 0xbee   : > { %1644 = vmatpush.msra.mxu1 %v3951_v15 }
 0xbef   : > { %v1262_v48 = vmax.f32 %v1255_v63, 0.0  ;;  %v3971_v63 = vld [vmem:[#allocation64_spill] sm:$0xff] }
 0xbf0   : > { %1645 = vmatpush.msra.mxu1 %v3953_v61  ;;  %v2400_v61 = vld [vmem:[%s3832_s20 + $0x1] ss:$0 sm:$0xff] (%p3717_p0) }
 0xbf1   : > { %2110 = vmatmul.msk.f32.gmra.mxu1 %vm565_vm4, %v1262_v48 }
 0xbf4   : > { %v1257_v37 = vpop.f32.mrf.mxu0 }
 0xbf5   : > { %v1258_v25 = vadd.f32 %v1257_v37, %v3367_v24  ;;  %v1365_v37 = vpop.permute.xlu2 %1364 }
 0xbf7   : > { %v1263_v0 = vmax.f32 %v1258_v25, 0.0 }
 0xbf9   : > { %2111 = vmatmul.msk.f32.gmra.mxu1 %vm565_vm4, %v1263_v0 }
 0xc5e   : > { %v1293_v10 = vpop.f32.mrf.mxu1 }
 0xc5f   : > { %v1294_v57 = vadd.f32 %v1293_v10, %v3386_v62  ;;  %v3972_v10 = vld [vmem:[#allocation65_spill] sm:$0xff] }
 0xc61   : > { %v1305_v9 = vmax.f32 %v1294_v57, 0.0 }
 0xc66   : > { %v1296_v20 = vpop.f32.mrf.mxu1 }
 0xc67   : > { %v1297_v28 = vadd.f32 %v1296_v20, %v3386_v62 }
 0xc69   : > { %v1306_v24 = vmax.f32 %v1297_v28, 0.0 }
 0xc6e   : > { %v1299_v2 = vpop.f32.mrf.mxu1 }
 0xc6f   : > { %v1300_v49 = vadd.f32 %v1299_v2, %v3386_v62  ;;  %v1367_v2 = vpop.permute.xlu0 %1366 }
 0xc71   : > { %v1307_v6 = vmax.f32 %v1300_v49, 0.0 }
 0xc76   : > { %v1302_v50 = vpop.f32.mrf.mxu1 }
 0xc77   : > { %v1303_v4 = vadd.f32 %v1302_v50, %v3386_v62  ;;  %v3970_v62 = vld [vmem:[#allocation34_spill] sm:$0xff] }
 0xc79   : > { %v1308_v18 = vmax.f32 %v1303_v4, 0.0  ;;  %v3973_v4 = vld [vmem:[#allocation66_spill] sm:$0xff] }
 0xc7b   : > { %2112 = vmatpush.msk.msra.mxu2 %vm666_vm5, %v1308_v18 }
 0xc7d   : > { %1325 = vmatpush.msra.mxu2 %v1307_v6 }
 0xc7f   : > { %1326 = vmatpush.msra.mxu2 %v1306_v24 }
 0xc81   : > { %1327 = vmatpush.msra.mxu2 %v1305_v9 }
 0xc82   : > { %2113 = vmatmul.msk.f32.vlgmr.msra.gmra.mxu2 %vm659_vm6, %v3069_v5  ;;  %v1825_v5 = vld [vmem:[%s3831_s19] sm:$0xff] (%p3717_p0) }
 0xc83   : > { %1528 = vmatpush.msrb.mxu2 %v3165_v32  ;;  %v2144_v32 = vld [vmem:[%s3831_s19 + $0x20] sm:$0xff] (%p3717_p0) }
 0xc85   : > { %1529 = vmatpush.msrb.mxu2 %v3163_v31  ;;  %v2145_v31 = vld [vmem:[%s3831_s19 + $0x28] sm:$0xff] (%p3717_p0) }
 0xc87   : > { %1530 = vmatpush.msrb.mxu2 %v3161_v30  ;;  %v2146_v30 = vld [vmem:[%s3831_s19 + $0x30] sm:$0xff] (%p3717_p0) }
 0xc89   : > { %1531 = vmatpush.msrb.mxu2 %v3969_v7 }
 0xc8a   : > { %2114 = vmatmul.msk.f32.gmra.mxu2 %vm659_vm6, %v3970_v62 }
 0xd05   : > { %v1329_v21 = vpop.f32.mrf.mxu2 }
 0xd06   : > { %2115 = vmatmul.msk.f32.vlgmr.msra.gmra.mxu3 %vm565_vm4, %v1329_v21 }
 0xd0d   : > { %v1332_v26 = vpop.f32.mrf.mxu2 }
 0xd0e   : > { %2116 = vmatmul.msk.f32.gmra.mxu3 %vm565_vm4, %v1332_v26 }
 0xd89   : > { %v1358_v39 = vpop.f32.mrf.mxu3 }
 0xd8a   : > { %v1359_v48 = vadd.f32 %v1358_v39, %v3971_v63 }
 0xd8c   : > { %v1370_v25 = vsel %vm565_vm4, %v1359_v48, %v1365_v37 }
 0xd8d   : > { %2117 = vmatmul.msk.f32.vlgmr.msrb.gmra.mxu0 %vm750_vm7, %v1370_v25 }
 0xd91   : > { %v1361_v0 = vpop.f32.mrf.mxu3 }
 0xd92   : > { %v1362_v20 = vadd.f32 %v1361_v0, %v3972_v10 }
 0xd94   : > { %v1371_v50 = vsel %vm565_vm4, %v1362_v20, %v1367_v2 }
 0xd95   : > { %2118 = vmatmul.msk.f32.gmra.mxu0 %vm750_vm7, %v1371_v50 }
 0xe0a   : > { %v1395_v49 = vpop.f32.mrf.mxu0 }
 0xe0b   : > { %v1396_v28 = vadd.f32 %v1395_v49, %v3973_v4 }
 0xe0d   : > { %2351 = vtanh.f32 %v1396_v28  ;;  %v2119_v21 = vmul.f32 -1.442695, %v1396_v28 }
 0xe12   : > { %v1398_v18 = vpop.f32.mrf.mxu0 }
 0xe13   : > { %v2352_v57 = vpop.eup %2351  ;;  %v1399_v6 = vadd.f32 %v1398_v18, %v3973_v4 }
 0xe14   : > { %1445 = vrot.lane.b32.xlu1 %v2352_v57, %s2851_s23 }
 0xe15   : > { %2353 = vtanh.f32 %v1399_v6  ;;  %v2120_v9 = vmul.f32 -1.442695, %v1399_v6 }
 0xe17   : > { %2355 = vpow2.f32 %v2120_v9 }
 0xe1b   : > { %v2354_v24 = vpop.eup %2353 }
 0xe1c   : > { %1447 = vrot.lane.b32.xlu2 %v2354_v24, %s2851_s23 }
 0xe1d   : > { %v2356_v7 = vpop.eup %2355 }
 0xe1e   : > { %v1408_v62 = vadd.f32 1.0, %v2356_v7 }
 0xe20   : > { %2357 = vrcp.f32 %v1408_v62  ;;  %v1435_v20 = vand.u32 2147483648, %v1408_v62  ;;  %vm1429_vm13 = vweird.f32 %v1408_v62  ;;  %v1433_v2 = vand.u32 2147483647, %v1408_v62 }
 0xe21   : > { %2359 = vpow2.f32 %v2119_v21 }
 0xe22   : > { %v1436_v4 = vor.u32 1.1754944e-38, %v1435_v20  ;;  %vm1434_vm15 = vcmp.eq.f32.partialorder %v1433_v2, 8.507059e+37 }
 0xe26   : > { %v2358_v26 = vpop.eup %2357 }
 0xe27   : > { %v2360_v39 = vpop.eup %2359  ;;  %v1425_v63 = vmul.f32 %v2358_v26, %v1408_v62  ;;  %vm1430_vm12 = vweird.f32 %v2358_v26 }
 0xe28   : > { %v1407_v48 = vadd.f32 1.0, %v2360_v39  ;;  %vm1431_vm14 = vmor %vm1429_vm13, %vm1430_vm12 }
 0xe29   : > { %v1426_v37 = vsub.f32 1.0, %v1425_v63 }
 0xe2a   : > { %2361 = vrcp.f32 %v1407_v48  ;;  %v1420_v7 = vand.u32 2147483648, %v1407_v48  ;;  %vm1414_vm3 = vweird.f32 %v1407_v48  ;;  %v1418_v21 = vand.u32 2147483647, %v1407_v48 }
 0xe2b   : > { %v1427_v25 = vmul.f32 %v2358_v26, %v1426_v37 }
 0xe2c   : > { %v1421_v62 = vor.u32 1.1754944e-38, %v1420_v7  ;;  %vm1419_vm9 = vcmp.eq.f32.partialorder %v1418_v21, 8.507059e+37 }
 0xe2d   : > { %v1428_v0 = vadd.f32 %v2358_v26, %v1427_v25 }
 0xe2f   : > { %v1432_v50 = vsel %vm1431_vm14, %v2358_v26, %v1428_v0 }
 0xe30   : > { %v2362_v10 = vpop.eup %2361  ;;  %v1437_v18 = vsel %vm1434_vm15, %v1436_v4, %v1432_v50 }
 0xe31   : > { %v1410_v49 = vmul.f32 %v2362_v10, %v1407_v48  ;;  %vm1415_vm2 = vweird.f32 %v2362_v10  ;;  %v1442_v25 = vmul.f32 %v1437_v18, %v3446_v3 }
 0xe32   : > { %vm1416_vm8 = vmor %vm1414_vm3, %vm1415_vm2 }
 0xe33   : > { %v1411_v6 = vsub.f32 1.0, %v1410_v49 }
 0xe35   : > { %v1412_v24 = vmul.f32 %v2362_v10, %v1411_v6 }
 0xe37   : > { %v1413_v9 = vadd.f32 %v2362_v10, %v1412_v24 }
 0xe39   : > { %v1417_v39 = vsel %vm1416_vm8, %v2362_v10, %v1413_v9 }
 0xe3a   : > { %v1422_v63 = vsel %vm1419_vm9, %v1421_v62, %v1417_v39 }
 0xe3b   : > { %v1441_v48 = vmul.f32 %v1422_v63, %v3442_v11 }
 0xe76   : > { %v1448_v28 = vpop.permute.xlu2 %1447 }
 0xe77   : > { %v1452_v57 = vmul.f32 %v1448_v28, %v1437_v18 }
 0xe79   : > { %1457 = vrot.lane.b32.xlu1 %v1452_v57, %s2850_s13 }
 0xe86   : > { %v1446_v26 = vpop.permute.xlu1 %1445 }
 0xe87   : > { %v1451_v37 = vmul.f32 %v1446_v26, %v1422_v63 }
 0xe89   : > { %1455 = vrot.lane.b32.xlu0 %v1451_v37, %s2850_s13 }
 0xeeb   : > { %v1458_v0 = vpop.permute.xlu1 %1457 }
 0xeec   : > { %v3633_v4 = vadd.f32 %v1458_v0, %v1442_v25  }
 0xeee   : > { %2363 = vtanh.f32 %v3633_v4 }
 0xef4   : > { %v2364_v20 = vpop.eup %2363 }
 0xef5   : > { %1469 = vrot.lane.b32.xlu0 %v2364_v20, %s2851_s23 }
 0xefb   : > { %v1456_v10 = vpop.permute.xlu0 %1455 }
 0xefc   : > { %v3638_v57 = vadd.f32 %v1456_v10, %v1441_v48  }
 0xefd   : > { %1602 = vrot.lane.b32.xlu0 %v3564_v1, %s2851_s23 }
 0xefe   : > { %2365 = vtanh.f32 %v3638_v57 }
 0xf04   : > { %v2366_v2 = vpop.eup %2365 }
 0xf05   : > { %1608 = vrot.lane.b32.xlu0 %v3579_v27, %s2851_s23  ;;  %1467 = vrot.lane.b32.xlu2 %v2366_v2, %s2851_s23 }
 0xf5f   : > { %v1468_v3 = vpop.permute.xlu2 %1467 }
 0xf60   : > { %v1473_v50 = vmul.f32 %v1468_v3, %v1422_v63 }
 0xf62   : > { %1477 = vrot.lane.b32.xlu1 %v1473_v50, %s2850_s13 }
 0xf67   : > { %v1470_v49 = vpop.permute.xlu0 %1469 }
 0xf68   : > { %v1474_v11 = vmul.f32 %v1470_v49, %v1437_v18 }
 0xf6a   : > { %1604 = vrot.lane.b32.xlu1 %v3569_v14, %s2851_s23  ;;  %1479 = vrot.lane.b32.xlu2 %v1474_v11, %s2850_s13 }
 0xf72   : > { %1606 = vrot.lane.b32.xlu2 %v3573_v58, %s2851_s23 }
 0xfc4   : > { %v3656_v58 = vpop.permute.xlu2 %1479  }
 0xfcc   : > { %v1607_v2 = vpop.permute.xlu2 %1606 }
 0xfd4   : > { %v3652_v9 = vpop.permute.xlu1 %1477  }
 0xfd5   : > { %2121 = vmatmul.msk.f32.vlgmr.msrb.gmra.mxu1 %vm565_vm4, %v3652_v9 }
 0xfdd   : > { %2122 = vmatmul.msk.f32.gmra.mxu1 %vm565_vm4, %v3656_v58 }
0x1052   : > { %v1502_v1 = vpop.f32.mrf.mxu1 }
0x1053   : > { %v1503_v27 = vadd.f32 %v1502_v1, %v3474_v59 }
0x1055   : > { %v1508_v28 = vmax.f32 %v1503_v27, 0.0 }
0x1057   : > { %2123 = vmatmul.msk.f32.vlgmr.msrb.gmra.mxu2 %vm565_vm4, %v1508_v28 }
0x105a   : > { %v1505_v14 = vpop.f32.mrf.mxu1 }
0x105b   : > { %v1506_v18 = vadd.f32 %v1505_v14, %v3474_v59 }
0x105d   : > { %v1509_v6 = vmax.f32 %v1506_v18, 0.0 }
0x105f   : > { %2124 = vmatmul.msk.f32.gmra.mxu2 %vm565_vm4, %v1509_v6 }
0x10da   : > { %v1533_v24 = vpop.f32.mrf.mxu2 }
0x10db   : > { %v1534_v7 = vadd.f32 %v1533_v24, %v3489_v12 }
0x10dd   : > { %v1539_v21 = vmax.f32 %v1534_v7, 0.0 }
0x10df   : > { %2125 = vmatmul.msk.f32.vlgmr.msrb.gmra.mxu3 %vm565_vm4, %v1539_v21 }
0x10e2   : > { %v1536_v39 = vpop.f32.mrf.mxu2 }
0x10e3   : > { %v1537_v62 = vadd.f32 %v1536_v39, %v3489_v12  ;;  %v1603_v12 = vpop.permute.xlu0 %1602 }
0x10e5   : > { %v1540_v26 = vmax.f32 %v1537_v62, 0.0 }
0x10e7   : > { %2126 = vmatmul.msk.f32.gmra.mxu3 %vm565_vm4, %v1540_v26 }
0x10eb   : > { %v1609_v49 = vpop.permute.xlu0 %1608 }
0x1162   : > { %v1564_v63 = vpop.f32.mrf.mxu3 }
0x1163   : > { %v1565_v59 = vadd.f32 %v1564_v63, %v3500_v22 }
0x116a   : > { %v1567_v37 = vpop.f32.mrf.mxu3 }
0x116b   : > { %v1568_v25 = vadd.f32 %v1567_v37, %v3500_v22  ;;  %v1605_v22 = vpop.permute.xlu1 %1604 }
0x116d   : > { %2127 = vmatpush.msk.msra.mxu0 %vm357_vm1, %v1568_v25  ;;  %vm1997_vm1 = vcmask (%p3717_p0), 1024  }
0x116f   : > { %1588 = vmatpush.msra.mxu0 %v1565_v59 }
0x1170   : > { %2128 = vmatmul.msk.f32.vlgmr.msra.gmra.mxu0 %vm958_vm0, %v3962_v29 }
0x1178   : > { %2129 = vmatmul.msk.f32.gmra.mxu0 %vm958_vm0, %v3963_v13 }
0x1180   : > { %2130 = vmatmul.msk.f32.gmra.mxu0 %vm958_vm0, %v3965_v16 }
0x1188   : > { %2131 = vmatmul.msk.f32.gmra.mxu0 %vm958_vm0, %v3967_v17 }
0x11ed   : > { %v1590_v0 = vpop.f32.mrf.mxu0 }
0x11ee   : > { %v1614_v20 = vsel %vm565_vm4, %v1590_v0, %v1603_v12 }
0x11ef   : > { %2132 = vmatmul.msk.f32.vlgmr.msra.gmra.mxu1 %vm750_vm7, %v1614_v20 }
0x11f5   : > { %v1593_v48 = vpop.f32.mrf.mxu0 }
0x11f6   : > { %v1615_v10 = vsel %vm565_vm4, %v1593_v48, %v1605_v22 }
0x11f7   : > { %2133 = vmatmul.msk.f32.gmra.mxu1 %vm750_vm7, %v1615_v10 }
0x11fd   : > { %v1596_v3 = vpop.f32.mrf.mxu0 }
0x11fe   : > { %v1616_v50 = vsel %vm565_vm4, %v1596_v3, %v1607_v2 }
0x11ff   : > { %2134 = vmatmul.msk.f32.gmra.mxu1 %vm750_vm7, %v1616_v50 }
0x1205   : > { %v1599_v11 = vpop.f32.mrf.mxu0 }
0x1206   : > { %v1617_v1 = vsel %vm565_vm4, %v1599_v11, %v1609_v49 }
0x1207   : > { %2135 = vmatmul.msk.f32.gmra.mxu1 %vm750_vm7, %v1617_v1 }
0x126c   : > { %v1647_v27 = vpop.f32.mrf.mxu1 }
0x126d   : > { %v1648_v28 = vadd.f32 %v1647_v27, %v3526_v60 }
0x126f   : > { %2367 = vtanh.f32 %v1648_v28  ;;  %v2136_v12 = vmul.f32 -1.442695, %v1648_v28 }
0x1274   : > { %v1650_v14 = vpop.f32.mrf.mxu1 }
0x1275   : > { %v2368_v18 = vpop.eup %2367  ;;  %v1651_v6 = vadd.f32 %v1650_v14, %v3526_v60 }
0x1276   : > { %1747 = vrot.lane.b32.xlu1 %v2368_v18, %s2851_s23 }
0x1277   : > { %2369 = vtanh.f32 %v1651_v6  ;;  %v2137_v37 = vmul.f32 -1.442695, %v1651_v6 }
0x127c   : > { %v1653_v24 = vpop.f32.mrf.mxu1 }
0x127d   : > { %v2370_v7 = vpop.eup %2369  ;;  %v1654_v21 = vadd.f32 %v1653_v24, %v3526_v60 }
0x127e   : > { %1749 = vrot.lane.b32.xlu2 %v2370_v7, %s2851_s23 }
0x127f   : > { %2371 = vtanh.f32 %v1654_v21  ;;  %v2138_v2 = vmul.f32 -1.442695, %v1654_v21 }
0x1284   : > { %v1656_v39 = vpop.f32.mrf.mxu1 }
0x1285   : > { %v2372_v62 = vpop.eup %2371  ;;  %v1657_v26 = vadd.f32 %v1656_v39, %v3526_v60 }
0x1286   : > { %1751 = vrot.lane.b32.xlu0 %v2372_v62, %s2851_s23 }
0x1287   : > { %2373 = vtanh.f32 %v1657_v26  ;;  %v2139_v11 = vmul.f32 -1.442695, %v1657_v26 }
0x1288   : > { %2375 = vpow2.f32 %v2137_v37 }
0x128d   : > { %v2374_v63 = vpop.eup %2373 }
0x128e   : > { %1753 = vrot.lane.b32.xlu1 %v2374_v63, %s2851_s23  ;;  %v2376_v25 = vpop.eup %2375 }
0x128f   : > { %v1672_v59 = vadd.f32 1.0, %v2376_v25 }
0x1291   : > { %2377 = vrcp.f32 %v1672_v59  ;;  %v1701_v49 = vand.u32 2147483648, %v1672_v59  ;;  %vm1695_vm0 = vweird.f32 %v1672_v59  ;;  %v1699_v1 = vand.u32 2147483647, %v1672_v59 }
0x1292   : > { %2379 = vpow2.f32 %v2136_v12 }
0x1293   : > { %v1702_v18 = vor.u32 1.1754944e-38, %v1701_v49  ;;  %vm1700_vm11 = vcmp.eq.f32.partialorder %v1699_v1, 8.507059e+37 }
0x1297   : > { %v2378_v0 = vpop.eup %2377 }
0x1298   : > { %v2380_v20 = vpop.eup %2379  ;;  %v1691_v22 = vmul.f32 %v2378_v0, %v1672_v59  ;;  %vm1696_vm7 = vweird.f32 %v2378_v0 }
0x1299   : > { %v1671_v48 = vadd.f32 1.0, %v2380_v20  ;;  %vm1697_vm10 = vmor %vm1695_vm0, %vm1696_vm7 }
0x129a   : > { %v1692_v10 = vsub.f32 1.0, %v1691_v22 }
0x129b   : > { %2381 = vrcp.f32 %v1671_v48  ;;  %v1686_v59 = vand.u32 2147483648, %v1671_v48  ;;  %vm1680_vm13 = vweird.f32 %v1671_v48  ;;  %v1684_v12 = vand.u32 2147483647, %v1671_v48 }
0x129c   : > { %v1693_v60 = vmul.f32 %v2378_v0, %v1692_v10  ;;  %2383 = vpow2.f32 %v2138_v2 }
0x129d   : > { %2385 = vpow2.f32 %v2139_v11  ;;  %v1687_v22 = vor.u32 1.1754944e-38, %v1686_v59  ;;  %vm1685_vm15 = vcmp.eq.f32.partialorder %v1684_v12, 8.507059e+37 }
0x129e   : > { %v1694_v3 = vadd.f32 %v2378_v0, %v1693_v60 }
0x12a0   : > { %v1698_v28 = vsel %vm1697_vm10, %v2378_v0, %v1694_v3 }
0x12a1   : > { %v2382_v50 = vpop.eup %2381  ;;  %v3695_v7 = vsel %vm1700_vm11, %v1702_v18, %v1698_v28 }
0x12a2   : > { %v2384_v27 = vpop.eup %2383  ;;  %v1676_v14 = vmul.f32 %v2382_v50, %v1671_v48  ;;  %vm1681_vm12 = vweird.f32 %v2382_v50 }
0x12a3   : > { %v1673_v6 = vadd.f32 1.0, %v2384_v27  ;;  %v2386_v62 = vpop.eup %2385  ;;  %vm1682_vm14 = vmor %vm1680_vm13, %vm1681_vm12 }
0x12a4   : > { %v1677_v39 = vsub.f32 1.0, %v1676_v14  ;;  %v1674_v63 = vadd.f32 1.0, %v2386_v62 }
0x12a5   : > { %2387 = vrcp.f32 %v1673_v6  ;;  %v1716_v14 = vand.u32 2147483648, %v1673_v6  ;;  %vm1710_vm3 = vweird.f32 %v1673_v6  ;;  %v1714_v48 = vand.u32 2147483647, %v1673_v6 }
0x12a6   : > { %v1678_v26 = vmul.f32 %v2382_v50, %v1677_v39  ;;  %2389 = vrcp.f32 %v1674_v63  ;;  %vm1725_vm0 = vweird.f32 %v1674_v63  ;;  %v1729_v59 = vand.u32 2147483647, %v1674_v63 }
0x12a7   : > { %vm1715_vm9 = vcmp.eq.f32.partialorder %v1714_v48, 8.507059e+37 }
0x12a8   : > { %v1679_v37 = vadd.f32 %v2382_v50, %v1678_v26  ;;  %vm1730_vm11 = vcmp.eq.f32.partialorder %v1729_v59, 8.507059e+37 }
0x12aa   : > { %v1683_v0 = vsel %vm1682_vm14, %v2382_v50, %v1679_v37  ;;  %v1731_v37 = vand.u32 2147483648, %v1674_v63 }
0x12ab   : > { %v2388_v25 = vpop.eup %2387  ;;  %v1688_v2 = vsel %vm1685_vm15, %v1687_v22, %v1683_v0 }
0x12ac   : > { %v1706_v20 = vmul.f32 %v2388_v25, %v1673_v6  ;;  %v2390_v49 = vpop.eup %2389  ;;  %vm1711_vm2 = vweird.f32 %v2388_v25  ;;  %v1732_v0 = vor.u32 1.1754944e-38, %v1731_v37  ;;  %v1739_v22 = vmul.f32 %v1688_v2, %v3544_v38 }
0x12ad   : > { %v1721_v1 = vmul.f32 %v2390_v49, %v1674_v63  ;;  %vm1712_vm8 = vmor %vm1710_vm3, %vm1711_vm2  ;;  %vm1726_vm7 = vweird.f32 %v2390_v49 }
0x12ae   : > { %v1707_v3 = vsub.f32 1.0, %v1706_v20  ;;  %vm1727_vm10 = vmor %vm1725_vm0, %vm1726_vm7 }
0x12af   : > { %v1722_v28 = vsub.f32 1.0, %v1721_v1 }
0x12b0   : > { %v1708_v11 = vmul.f32 %v2388_v25, %v1707_v3 }
0x12b1   : > { %v1723_v18 = vmul.f32 %v2390_v49, %v1722_v28 }
0x12b2   : > { %v1709_v27 = vadd.f32 %v2388_v25, %v1708_v11 }
0x12b3   : > { %v1724_v26 = vadd.f32 %v2390_v49, %v1723_v18 }
0x12b4   : > { %v1713_v50 = vsel %vm1712_vm8, %v2388_v25, %v1709_v27 }
0x12b5   : > { %v1728_v12 = vsel %vm1727_vm10, %v2390_v49, %v1724_v26 }
0x12b6   : > { %v1733_v20 = vsel %vm1730_vm11, %v1732_v0, %v1728_v12 }
0x12b7   : > { %v1742_v49 = vmul.f32 %v1733_v20, %v3555_v8 }
0x12d8   : > { %v1750_v24 = vpop.permute.xlu2 %1749 }
0x12d9   : > { %v1760_v21 = vmul.f32 %v1750_v24, %v3695_v7  ;;  %v1717_v24 = vor.u32 1.1754944e-38, %v1716_v14 }
0x12db   : > { %1769 = vrot.lane.b32.xlu0 %v1760_v21, %s2850_s13  ;;  %v1718_v21 = vsel %vm1715_vm9, %v1717_v24, %v1713_v50 }
0x12dc   : > { %v1741_v27 = vmul.f32 %v1718_v21, %v3560_v23 }
0x12e8   : > { %v1748_v10 = vpop.permute.xlu1 %1747 }
0x12e9   : > { %v1759_v60 = vmul.f32 %v1748_v10, %v1688_v2 }
0x12eb   : > { %1767 = vrot.lane.b32.xlu2 %v1759_v60, %s2850_s13  ;;  %v1740_v60 = vmul.f32 %v3695_v7, %v3549_v19 }
0x12f8   : > { %v1752_v39 = vpop.permute.xlu0 %1751 }
0x12f9   : > { %v1761_v62 = vmul.f32 %v1752_v39, %v1718_v21 }
0x12fb   : > { %1771 = vrot.lane.b32.xlu1 %v1761_v62, %s2850_s13 }
0x1300   : > { %v1754_v6 = vpop.permute.xlu1 %1753 }
0x1301   : > { %v1762_v25 = vmul.f32 %v1754_v6, %v1733_v20 }
0x1303   : > { %1773 = vrot.lane.b32.xlu2 %v1762_v25, %s2850_s13 }
0x1345   : > { %v1768_v10 = vpop.permute.xlu2 %1767 }
0x1346   : > { %v1779_v39 = vadd.f32 %v1768_v10, %v1739_v22   ;;  %v1826_v22 = vld [vmem:[%s3831_s19 + $0x8] sm:$0xff] (%p3717_p0)  ;;  %v1990_v10 = vld [vmem:[%s3980_s15] sm:$0x3] (%p3717_p0) }
0x1348   : > { %2391 = vtanh.f32 %v1779_v39 }
0x134d   : > { %v1770_v3 = vpop.permute.xlu0 %1769 }
0x134e   : > { %v2392_v11 = vpop.eup %2391  ;;  %v1780_v37 = vadd.f32 %v1770_v3, %v1740_v60  }
0x134f   : > { %1791 = vrot.lane.b32.xlu0 %v2392_v11, %s2851_s23 }
0x1350   : > { %2393 = vtanh.f32 %v1780_v37  ;;  %v1934_v37 = vld [vmem:[#allocation5] sm:$0x3] (%p3717_p0) }
0x1356   : > { %v2394_v63 = vpop.eup %2393 }
0x1357   : > { %1793 = vrot.lane.b32.xlu1 %v2394_v63, %s2851_s23 }
0x135d   : > { %v1774_v1 = vpop.permute.xlu2 %1773 }
0x135e   : > { %v1782_v1 = vadd.f32 %v1774_v1, %v1742_v49  }
0x1360   : > { %2395 = vtanh.f32 %v1782_v1 }
0x1366   : > { %v2396_v38 = vpop.eup %2395 }
0x1367   : > { %1797 = vrot.lane.b32.xlu0 %v2396_v38, %s2851_s23 }
0x136d   : > { %v1772_v19 = vpop.permute.xlu1 %1771 }
0x136e   : > { %v1781_v28 = vadd.f32 %v1772_v19, %v1741_v27  }
0x1370   : > { %2397 = vtanh.f32 %v1781_v28 }
0x1376   : > { %v2398_v14 = vpop.eup %2397 }
0x1377   : > { %1795 = vrot.lane.b32.xlu2 %v2398_v14, %s2851_s23 }
0x13c1   : > { %v1792_v48 = vpop.permute.xlu0 %1791 }
0x13c2   : > { %v1803_v50 = vmul.f32 %v1792_v48, %v1688_v2  ;;  %v3975_v2 = vmov %v1781_v28 }
0x13c4   : > { %1811 = vrot.lane.b32.xlu1 %v1803_v50, %s2850_s13 }
0x13c9   : > { %v1794_v18 = vpop.permute.xlu1 %1793 }
0x13ca   : > { %v1804_v8 = vmul.f32 %v1794_v18, %v3695_v7  ;;  %v1828_v7 = vld [vmem:[%s3831_s19 + $0x18] sm:$0xff] (%p3717_p0) }
0x13cb   :  { %1858 = vmatpush.msra.mxu0 (%p3717_p0), %v1828_v7  ;;  %2164 = vmatpush.msra.mxu2 (%p3717_p0), %v1828_v7 }
0x13cc   : > { %1813 = vrot.lane.b32.xlu2 %v1804_v8, %s2850_s13 }
0x13d1   : > { %v1796_v24 = vpop.permute.xlu2 %1795 }
0x13d2   : > { %v1805_v62 = vmul.f32 %v1796_v24, %v1718_v21  ;;  %v1827_v21 = vld [vmem:[%s3831_s19 + $0x10] sm:$0xff] (%p3717_p0) }
0x13d3   :  { %1859 = vmatpush.msra.mxu0 (%p3717_p0), %v1827_v21  ;;  %2165 = vmatpush.msra.mxu2 (%p3717_p0), %v1827_v21 }
0x13d4   : > { %1815 = vrot.lane.b32.xlu0 %v1805_v62, %s2850_s13 }
0x13d5   :  { %1860 = vmatpush.msra.mxu0 (%p3717_p0), %v1826_v22  ;;  %2166 = vmatpush.msra.mxu2 (%p3717_p0), %v1826_v22 }
0x13d7   :  { %1861 = vmatpush.msra.mxu0 (%p3717_p0), %v1825_v5  ;;  %2167 = vmatpush.msra.mxu2 (%p3717_p0), %v1825_v5 }
0x13d9   : > { %v1798_v23 = vpop.permute.xlu0 %1797 }
0x13da   : > { %v1806_v26 = vmul.f32 %v1798_v23, %v1733_v20  ;;  %v2147_v20 = vld [vmem:[%s3831_s19 + $0x38] sm:$0xff] (%p3717_p0) }
0x13db   :  { %1913 = vmatpush.msra.mxu1 (%p3717_p0), %v2147_v20  ;;  %2168 = vmatpush.msra.mxu3 (%p3717_p0), %v2147_v20 }
0x13dc   : > { %1817 = vrot.lane.b32.xlu1 %v1806_v26, %s2850_s13 }
0x13dd   :  { %1914 = vmatpush.msra.mxu1 (%p3717_p0), %v2146_v30  ;;  %2169 = vmatpush.msra.mxu3 (%p3717_p0), %v2146_v30 }
0x13df   :  { %1915 = vmatpush.msra.mxu1 (%p3717_p0), %v2145_v31  ;;  %2170 = vmatpush.msra.mxu3 (%p3717_p0), %v2145_v31 }
0x13e1   :  { %1916 = vmatpush.msra.mxu1 (%p3717_p0), %v2144_v32  ;;  %2171 = vmatpush.msra.mxu3 (%p3717_p0), %v2144_v32 }
0x13e3   :  { %1982 = vmatpush.msrb.mxu3 (%p3717_p0), %v1966_v52 }
0x13e5   :  { %1983 = vmatpush.msrb.mxu3 (%p3717_p0), %v1965_v53 }
0x13e7   :  { %1984 = vmatpush.msrb.mxu3 (%p3717_p0), %v1964_v54 }
0x13e9   :  { %1985 = vmatpush.msrb.mxu3 (%p3717_p0), %v1963_v55 }
0x1426   : > { %v1814_v12 = vpop.permute.xlu2 %1813  }
0x1427   : > { %v3978_v59 = vmov %v1814_v12 }
0x1436   : > { %v1812_v0 = vpop.permute.xlu1 %1811  }
0x1437   : > { %v3979_v48 = vmov %v1812_v0  ;;  %2140 = vmatmul.msk.f32.vlgmr.msra.gmra.mxu0 (%p3717_p0), %vm565_vm4, %v1812_v0 }
0x143f   :  { %2141 = vmatmul.msk.f32.gmra.mxu0 (%p3717_p0), %vm565_vm4, %v1814_v12 }
0x1446   : > { %v1816_v6 = vpop.permute.xlu0 %1815  }
0x1447   : > { %v3977_v60 = vmov %v1816_v6  ;;  %2142 = vmatmul.msk.f32.gmra.mxu0 (%p3717_p0), %vm565_vm4, %v1816_v6 }
0x1448   :  { %v2401_v60 = vld [vmem:[#allocation2] ss:$0 sm:$0xff] (%p3717_p0) }
0x144b   :  { %548 = sbr.rel (!%p3717_p0) target bundleno = 651 (0x28b), region = 189 }
0x144e   : > { %v1818_v25 = vpop.permute.xlu1 %1817  }
0x144f   : > { %v3976_v50 = vmov %v1818_v25  ;;  %2143 = vmatmul.msk.f32.vlgmr.msra.gmra.mxu2 (%p3717_p0), %vm565_vm4, %v1818_v25 }
0x14b4   :  { %v1863_v34 = vpop.f32.mrf.mxu0 }
0x14b5   :  { %v1864_v35 = vadd.f32 %v2399_v33, %v1863_v34 }
0x14b7   :  { %v1875_v36 = vmax.f32 %v1864_v35, 0.0 }
0x14b9   :  { %2149 = vmatmul.msk.f32.vlgmr.msra.gmra.mxu1 %vm565_vm4, %v1875_v36 }
0x14bc   :  { %v1866_v42 = vpop.f32.mrf.mxu0 }
0x14bd   :  { %v1867_v43 = vadd.f32 %v2399_v33, %v1866_v42 }
0x14bf   :  { %v1876_v45 = vmax.f32 %v1867_v43, 0.0 }
0x14c1   :  { %2150 = vmatmul.msk.f32.gmra.mxu1 %vm565_vm4, %v1876_v45 }
0x14c4   :  { %v1869_v46 = vpop.f32.mrf.mxu0 }
0x14c5   :  { %v1870_v47 = vadd.f32 %v2399_v33, %v1869_v46 }
0x14c7   :  { %v1877_v51 = vmax.f32 %v1870_v47, 0.0 }
0x14c9   :  { %2151 = vmatmul.msk.f32.gmra.mxu1 %vm565_vm4, %v1877_v51 }
0x14d2   :  { %v1872_v40 = vpop.f32.mrf.mxu2 }
0x14d3   :  { %v1873_v41 = vadd.f32 %v2399_v33, %v1872_v40 }
0x14d5   :  { %v1878_v44 = vmax.f32 %v1873_v41, 0.0 }
0x14d7   :  { %2152 = vmatmul.msk.f32.vlgmr.msra.gmra.mxu3 %vm565_vm4, %v1878_v44 }
0x1536   :  { %v1918_v56 = vpop.f32.mrf.mxu1 }
0x1537   :  { %v1919_v57 = vadd.f32 %v2400_v61, %v1918_v56 }
0x1539   :  { %v1930_v39 = vmax.f32 %v1919_v57, 0.0 }
0x153e   :  { %v1921_v15 = vpop.f32.mrf.mxu1 }
0x153f   :  { %v1922_v58 = vadd.f32 %v2400_v61, %v1921_v15 }
0x1541   :  { %v1931_v2 = vmax.f32 %v1922_v58, 0.0 }
0x1546   :  { %v1924_v17 = vpop.f32.mrf.mxu1 }
0x1547   :  { %v1925_v4 = vadd.f32 %v2400_v61, %v1924_v17 }
0x1549   :  { %v1932_v9 = vmax.f32 %v1925_v4, 0.0 }
0x155a   :  { %v1927_v29 = vpop.f32.mrf.mxu3 }
0x155b   :  { %v1928_v13 = vadd.f32 %v2400_v61, %v1927_v29 }
0x155d   :  { %v1933_v16 = vmax.f32 %v1928_v13, 0.0 }
0x155f   :  { %2153 = vmatpush.msk.msrb.mxu2 %vm666_vm5, %v1933_v16 }
0x1561   :  { %1956 = vmatpush.msrb.mxu2 %v1932_v9 }
0x1563   :  { %1957 = vmatpush.msrb.mxu2 %v1931_v2 }
0x1565   :  { %1958 = vmatpush.msrb.mxu2 %v1930_v39 }
0x1566   :  { %2154 = vmatmul.msk.f32.vlgmr.msrb.gmra.mxu2 %vm659_vm6, %v1934_v37 }
0x15e9   :  { %v1960_v59 = vpop.f32.mrf.mxu2 }
0x15ea   :  { %2155 = vmatmul.msk.f32.vlgmr.msrb.gmra.mxu3 %vm565_vm4, %v1960_v59 }
0x166d   :  { %v1987_v3 = vpop.f32.mrf.mxu3 }
0x166e   :  { %v1991_v11 = vmul.f32 %v1990_v10, %v1987_v3 }
0x1670   :  { %v1996_v63 = vadd.f32 %v2401_v60, %v1991_v11 }
0x1672   :  { %1998 = vst.msk [vmem:[%s3981_s12] sm:$0x3] %vm1997_vm1, %v1996_v63 }
0x1673   :  { %2003 = vsyncpa [#allocation4], 1 }
0x1674   :  { %2004 = vsyncpa [#allocation6], 1 }
0x1675   :  { %2005 = vsyncpa [#allocation9], 1 }
0x1676   :  { %2006 = vsyncpa [#allocation12], 1 }
0x1677   :  { %2007 = vsyncpa [#allocation15], 1 }
0x1678   :  { %2008 = vsyncpa [#allocation18], 1 }
0x1679   :  { %2009 = vsyncpa [#allocation21], 1 }

</bundles_post_ra>
